<compile_context>
chip_gen: v7x
topology: tpu7x:2x2x1
jax: 0.10.0
libtpu: 0.0.40
codegen_flags: <defaults>
</compile_context>

<pallas_src>
import functools

import jax
import jax.numpy as jnp
import numpy as np
from jax import lax
from jax.experimental import pallas as pl
from jax.experimental.pallas import tpu as pltpu


# --------------------------------------------------------------------------
# Kernel
# --------------------------------------------------------------------------
def bottleneck_kernel(x_hbm, w1_ref, b1_ref, w2_ref, b2_ref, w3_ref, b3_ref,
                      o_ref, x_vmem, dma_sem, *, H, W, TH):
    """One (batch, row-tile) grid step.

    x_hbm  : (N, H+2, W, Cin) f32 in HBM (one zero halo row top/bottom)
    w1_ref : (Cin,  Cmid)   bf16  conv1 weight, BN1 scale folded in
    w2_ref : (9*Cmid, Cmid) bf16  conv2 weight, (dy, dx, cin) packed, BN2 folded
    w3_ref : (Cmid, Cout)   bf16  conv3 weight, BN3 scale folded in
    b*_ref : (1, C) f32           folded BN shifts
    o_ref  : (1, TH, W, Cout) f32 output row tile (NHWC)
    x_vmem : (TH+2, W, Cin) f32   scratch for the halo window
    """
    n = pl.program_id(0)
    t = pl.program_id(1)
    Cin = x_vmem.shape[-1]
    Cmid = w1_ref.shape[-1]
    Cout = w3_ref.shape[-1]
    L = (TH + 2) * W          # rows in the halo window (flattened)
    M = TH * W                # rows in the output tile (flattened)

    # ---- manual halo DMA: padded rows [t*TH, t*TH + TH + 2) ----------------
    # TODO(synk): double-buffer this copy across grid steps for full overlap
    # (needs "arbitrary" semantics on the row axis); output writeback and the
    # resident weights are still auto-pipelined by Pallas.
    row0 = pl.multiple_of(t * TH, TH)
    cp = pltpu.make_async_copy(x_hbm.at[n, pl.ds(row0, TH + 2)], x_vmem, dma_sem)
    cp.start()
    cp.wait()

    x2d = x_vmem[...].reshape(L, Cin)                       # f32

    # ---- conv1 (1x1) + bn1 shift + relu  (bf16 MXU operands, f32 acc) ------
    h1 = jnp.dot(x2d.astype(jnp.bfloat16), w1_ref[...],
                 preferred_element_type=jnp.float32)
    h1 = jnp.maximum(h1 + b1_ref[...], 0.0)                 # (L, Cmid) f32

    # Zero the halo rows that play the role of conv2's zero padding (they fall
    # on padded-image rows 0 / H+1, i.e. only the first / last row tile).
    row = (lax.broadcasted_iota(jnp.int32, (TH + 2, W, 1), 0)
           .reshape(L, 1) + t * TH)                         # padded-row index
    h1 = jnp.where((row >= 1) & (row <= H), h1, 0.0)

    # ---- conv2 (3x3, pad=1, stride=1) + bn2 shift + relu -------------------
    # dx-shifts packed along lanes, dy taps taken as *aligned* row slices of
    # the halo buffer => a single matmul with K = 9*Cmid on the MXU.
    col = lax.broadcasted_iota(jnp.int32, (TH + 2, W, 1), 1).reshape(L, 1)
    zrow = jnp.zeros((1, Cmid), jnp.float32)
    hm = jnp.where(col == 0, 0.0,
                   jnp.concatenate([zrow, h1[:-1]], axis=0))        # column c-1
    hp = jnp.where(col == W - 1, 0.0,
                   jnp.concatenate([h1[1:], zrow], axis=0))         # column c+1
    hcat = jnp.concatenate([hm, h1, hp], axis=-1).astype(jnp.bfloat16)   # (L, 3*Cmid)
    patch = jnp.concatenate(
        [hcat[0:M], hcat[W:W + M], hcat[2 * W:2 * W + M]], axis=-1)      # (M, 9*Cmid)
    h2 = jnp.dot(patch, w2_ref[...], preferred_element_type=jnp.float32)
    h2 = jnp.maximum(h2 + b2_ref[...], 0.0)                 # (M, Cmid) f32

    # ---- conv3 (1x1) + bn3 shift + relu ------------------------------------
    h3 = jnp.dot(h2.astype(jnp.bfloat16), w3_ref[...],
                 preferred_element_type=jnp.float32)
    h3 = jnp.maximum(h3 + b3_ref[...], 0.0)                 # (M, Cout) f32

    # ---- residual add (identity block: Cin == Cout) + final relu -----------
    res = x2d[W:W + M]                                      # center TH rows, f32
    out = jnp.maximum(h3 + res, 0.0)
    o_ref[0] = out.reshape(TH, W, Cout).astype(o_ref.dtype)


# --------------------------------------------------------------------------
# Wrapper
# --------------------------------------------------------------------------
def _vmem_limit_bytes(TH, W, Cin, Cmid, Cout):
    L, M = (TH + 2) * W, TH * W
    est = (L * Cin * 4                                   # x halo scratch
           + 2 * M * Cout * 4                            # double-buffered out tile
           + 2 * ((Cin * Cmid + 9 * Cmid * Cmid + Cmid * Cout) * 2
                  + (2 * Cmid + Cout) * 4)               # weights + shifts
           + L * Cmid * 4 * 4 + L * 3 * Cmid * 2         # h1 / hm / hp / hcat
           + M * 9 * Cmid * 2                            # packed conv2 patch
           + M * (Cmid + 3 * Cout) * 4)                  # h2 / h3 / res / out
    return min(max(2 * est, 4 * 1024 * 1024), 32 * 1024 * 1024)


def bottleneck_forward_nhwc(x, w1, b1, w2p, b2, w3, b3, *, tile_h=8):
    """x: (N, H, W, Cin) f32 NHWC -> (N, H, W, Cout) f32 NHWC (identity block)."""
    N, H, W, Cin = x.shape
    Cmid = w1.shape[-1]
    Cout = w3.shape[-1]
    assert Cin == Cout, "identity block requires inplane == midplane * 4"
    assert H % tile_h == 0 and W % 8 == 0

    # One zero halo row top/bottom so every row tile DMAs a fixed-size
    # (tile_h + 2)-row window; those rows are re-masked to zero after conv1,
    # which is exactly conv2's zero padding.
    xp = jnp.pad(x, ((0, 0), (1, 1), (0, 0), (0, 0)))

    # Constant-index weight blocks are only DMA'd once by the pipeline; they
    # are tiny here, so default buffering is fine (for late ResNet stages use
    # pipeline_mode=pl.Buffered(1) to avoid double-buffering multi-MiB weights).
    full = lambda a: pl.BlockSpec(a.shape, lambda n, t: (0,) * a.ndim)
    kernel = functools.partial(bottleneck_kernel, H=H, W=W, TH=tile_h)

    return pl.pallas_call(
        kernel,
        out_shape=jax.ShapeDtypeStruct((N, H, W, Cout), x.dtype),
        grid_spec=pltpu.PrefetchScalarGridSpec(
            num_scalar_prefetch=0,
            grid=(N, H // tile_h),
            in_specs=[
                pl.BlockSpec(memory_space=pl.ANY),   # x stays in HBM; manual halo DMA
                full(w1), full(b1),
                full(w2p), full(b2),
                full(w3), full(b3),
            ],
            out_specs=pl.BlockSpec((1, tile_h, W, Cout),
                                   lambda n, t: (n, t, 0, 0)),
            scratch_shapes=[
                pltpu.VMEM((tile_h + 2, W, Cin), x.dtype),
                pltpu.SemaphoreType.DMA,
            ],
        ),
        compiler_params=pltpu.CompilerParams(
            # Both axes are independent -> megacore / v7x can split the grid.
            dimension_semantics=("parallel", "parallel"),
            vmem_limit_bytes=_vmem_limit_bytes(tile_h, W, Cin, Cmid, Cout),
        ),
    )(xp, w1, b1, w2p, b2, w3, b3)


@jax.jit
def bottleneck_forward(x_nchw, w1, b1, w2p, b2, w3, b3):
    """PyTorch-parity adapter.  A real NHWC pipeline should call
    bottleneck_forward_nhwc directly and skip both full-tensor transposes."""
    x = jnp.transpose(x_nchw, (0, 2, 3, 1))                 # NCHW -> NHWC
    out = bottleneck_forward_nhwc(x, w1, b1, w2p, b2, w3, b3)
    return jnp.transpose(out, (0, 3, 1, 2))                 # NHWC -> NCHW


# --------------------------------------------------------------------------
# Parameters (synthetic, deterministic) and host-side folding / packing
# --------------------------------------------------------------------------
def fold_bn(gamma, beta, mean, var, eps=1e-5):
    scale = gamma / jnp.sqrt(var + eps)
    shift = beta - mean * scale
    return scale, shift


def make_params(key, inplane, midplane):
    """Synthetic module parameters (f32, 'module' layouts)."""
    outplane = midplane * 4
    keys = jax.random.split(key, 15)

    w1_oihw = jax.random.normal(keys[0], (midplane, inplane, 1, 1), jnp.float32) * 0.1
    w2_oihw = jax.random.normal(keys[1], (midplane, midplane, 3, 3), jnp.float32) * 0.1
    w3_oihw = jax.random.normal(keys[2], (outplane, midplane, 1, 1), jnp.float32) * 0.1
    w1 = jnp.transpose(w1_oihw[:, :, 0, 0], (1, 0))          # (Cin, Cmid)
    w2 = jnp.transpose(w2_oihw, (2, 3, 1, 0))                # (3,3,Cmid,Cmid) HWIO
    w3 = jnp.transpose(w3_oihw[:, :, 0, 0], (1, 0))          # (Cmid, Cout)

    def bn(k0, k1, k2, k3, c):
        gamma = 0.5 + jax.random.uniform(k0, (c,), jnp.float32)
        beta = jax.random.normal(k1, (c,), jnp.float32) * 0.1
        mean = jax.random.normal(k2, (c,), jnp.float32) * 0.1
        var = 0.5 + jax.random.uniform(k3, (c,), jnp.float32)
        return fold_bn(gamma, beta, mean, var)

    s1, b1 = bn(keys[3], keys[4], keys[5], keys[6], midplane)
    s2, b2 = bn(keys[7], keys[8], keys[9], keys[10], midplane)
    s3, b3 = bn(keys[11], keys[12], keys[13], keys[14], outplane)
    return w1, s1, b1, w2, s2, b2, w3, s3, b3


def prepare_params(w1, s1, b1, w2, s2, b2, w3, s3, b3):
    """Fold BN scales into the conv weights, pack conv2 for K=9*Cmid, cast bf16."""
    Cmid = w2.shape[2]
    w1f = (w1 * s1[None, :]).astype(jnp.bfloat16)                       # (Cin, Cmid)
    w2p = ((w2 * s2[None, None, None, :])
           .reshape(9 * Cmid, Cmid).astype(jnp.bfloat16))               # (9*Cmid, Cmid)
    w3f = (w3 * s3[None, :]).astype(jnp.bfloat16)                       # (Cmid, Cout)
    return (w1f, b1.reshape(1, -1), w2p, b2.reshape(1, -1),
            w3f, b3.reshape(1, -1))


# --------------------------------------------------------------------------
# Pure-JAX references
# --------------------------------------------------------------------------
def reference_f32_nhwc(x, w1, s1, b1, w2, s2, b2, w3, s3, b3):
    """Pure-f32 module semantics (unfolded BN), NHWC."""
    dn = ("NHWC", "HWIO", "NHWC")
    Cin, Cmid = w1.shape
    Cout = w3.shape[1]

    def bn_relu(h, s, b):
        return jnp.maximum(h * s.reshape(1, 1, 1, -1) + b.reshape(1, 1, 1, -1), 0.0)

    h = lax.conv_general_dilated(x, w1.reshape(1, 1, Cin, Cmid), (1, 1),
                                 "VALID", dimension_numbers=dn)
    h = bn_relu(h, s1, b1)
    h = lax.conv_general_dilated(h, w2, (1, 1), ((1, 1), (1, 1)),
                                 dimension_numbers=dn)
    h = bn_relu(h, s2, b2)
    h = lax.conv_general_dilated(h, w3.reshape(1, 1, Cmid, Cout), (1, 1),
                                 "VALID", dimension_numbers=dn)
    h = bn_relu(h, s3, b3)
    return jnp.maximum(h + x, 0.0)


def reference_bf16_nhwc(x, w1f, b1, w2p, b2, w3f, b3):
    """Same folded bf16 weights + bf16-rounded activations as the kernel's MXU
    path (f32 accumulation) -> matches the kernel up to f32 sum-order noise."""
    dn = ("NHWC", "HWIO", "NHWC")
    Cin, Cmid = w1f.shape
    Cout = w3f.shape[1]
    q = lambda a: a.astype(jnp.bfloat16).astype(jnp.float32)

    h = lax.conv_general_dilated(q(x), q(w1f).reshape(1, 1, Cin, Cmid), (1, 1),
                                 "VALID", dimension_numbers=dn)
    h = jnp.maximum(h + b1.reshape(1, 1, 1, -1), 0.0)
    h = lax.conv_general_dilated(q(h), q(w2p).reshape(3, 3, Cmid, Cmid), (1, 1),
                                 ((1, 1), (1, 1)), dimension_numbers=dn)
    h = jnp.maximum(h + b2.reshape(1, 1, 1, -1), 0.0)
    h = lax.conv_general_dilated(q(h), q(w3f).reshape(1, 1, Cmid, Cout), (1, 1),
                                 "VALID", dimension_numbers=dn)
    h = jnp.maximum(h + b3.reshape(1, 1, 1, -1), 0.0)
    return jnp.maximum(h + x, 0.0)


# --------------------------------------------------------------------------
if __name__ == "__main__":
    # Identity bottleneck block: inplane == midplane*4, stride=1, downsample=None.
    # Cout = 128 keeps the output lane-dense (review: masked vs unmasked stores).
    N, midplane, H, W = 2, 32, 16, 16
    inplane = midplane * 4

    key = jax.random.PRNGKey(0)
    kx, kp = jax.random.split(key)
    x_nchw = jax.random.normal(kx, (N, inplane, H, W), jnp.float32)   # PyTorch NCHW
    raw = make_params(kp, inplane, midplane)
    params = prepare_params(*raw)

    out = bottleneck_forward(x_nchw, *params)
    out = jax.block_until_ready(out)
    assert out.shape == (N, inplane, H, W)

    x_nhwc = jnp.transpose(x_nchw, (0, 2, 3, 1))

    # Tight check: reference mirrors the kernel's bf16-operand / f32-accumulate
    # quantization points, so it should agree to f32 sum-order noise.
    ref_b = jnp.transpose(reference_bf16_nhwc(x_nhwc, *params), (0, 3, 1, 2))
    np.testing.assert_allclose(np.asarray(out), np.asarray(ref_b),
                               rtol=5e-3, atol=5e-3)

    # Loose global check against pure-f32 module semantics (validates BN fold
    # and the conv2 tap packing end-to-end; bf16 operands cost ~0.5% RMS).
    ref_f = jnp.transpose(reference_f32_nhwc(x_nhwc, *raw), (0, 3, 1, 2))
    num = float(jnp.linalg.norm(out - ref_f))
    den = float(jnp.linalg.norm(ref_f)) + 1e-12
    assert num / den < 3e-2, f"relative error {num / den:.4f}"

    print("KERNEL_OK")
</pallas_src>

<mosaic_0001>
module attributes {stable_mosaic.version = 11 : i64} {
  func.func @bottleneck_kernel(%arg0: i32, %arg1: i32, %arg2: memref<2x18x16x128xf32, #tpu.memory_space<any>>, %arg3: memref<128x32xbf16, #tpu.memory_space<vmem>>, %arg4: memref<1x32xf32, #tpu.memory_space<vmem>>, %arg5: memref<288x32xbf16, #tpu.memory_space<vmem>>, %arg6: memref<1x32xf32, #tpu.memory_space<vmem>>, %arg7: memref<32x128xbf16, #tpu.memory_space<vmem>>, %arg8: memref<1x128xf32, #tpu.memory_space<vmem>>, %arg9: memref<1x8x16x128xf32, #tpu.memory_space<vmem>>, %arg10: memref<10x16x128xf32, #tpu.memory_space<vmem>>, %arg11: memref<!tpu.dma_semaphore, #tpu.memory_space<semaphore_mem>>) attributes {dimension_semantics = [#tpu.dimension_semantics<parallel>, #tpu.dimension_semantics<parallel>], iteration_bounds = array<i64: 2, 2>, scalar_prefetch = 0 : i64, scratch_operands = 2 : i64, tpu.core_type = #tpu.core_type<tc>, window_params = [{}, {pipeline_mode = #tpu.pipeline_mode<synchronous>, transform_indices = @transform_1, window_bounds = array<i64: 128, 32>}, {pipeline_mode = #tpu.pipeline_mode<synchronous>, transform_indices = @transform_2, window_bounds = array<i64: 1, 32>}, {pipeline_mode = #tpu.pipeline_mode<synchronous>, transform_indices = @transform_3, window_bounds = array<i64: 288, 32>}, {pipeline_mode = #tpu.pipeline_mode<synchronous>, transform_indices = @transform_4, window_bounds = array<i64: 1, 32>}, {pipeline_mode = #tpu.pipeline_mode<synchronous>, transform_indices = @transform_5, window_bounds = array<i64: 32, 128>}, {pipeline_mode = #tpu.pipeline_mode<synchronous>, transform_indices = @transform_6, window_bounds = array<i64: 1, 128>}, {transform_indices = @transform_7, window_bounds = array<i64: 1, 8, 16, 128>}]} {
    %c8_i32 = arith.constant 8 : i32
    %0 = arith.muli %arg1, %c8_i32 : i32
    %1 = tpu.assume_multiple %0, 8 : i32
    %c0_i32 = arith.constant 0 : i32
    %c0_i32_0 = arith.constant 0 : i32
    %2 = tpu.memref_slice %arg2[%arg0, %1, %c0_i32, %c0_i32_0] : memref<2x18x16x128xf32, #tpu.memory_space<any>> -> memref<1x10x16x128xf32, #tpu.memory_space<any>>
    %3 = tpu.memref_squeeze %2 : memref<1x10x16x128xf32, #tpu.memory_space<any>> -> memref<10x16x128xf32, #tpu.memory_space<any>>
    tpu.enqueue_dma source(%3 : memref<10x16x128xf32, #tpu.memory_space<any>>) target(%arg10 : memref<10x16x128xf32, #tpu.memory_space<vmem>>) target_semaphore(%arg11 : memref<!tpu.dma_semaphore, #tpu.memory_space<semaphore_mem>>)
    %c0_i32_1 = arith.constant 0 : i32
    %c0_i32_2 = arith.constant 0 : i32
    %4 = tpu.memref_slice %arg2[%arg0, %1, %c0_i32_1, %c0_i32_2] : memref<2x18x16x128xf32, #tpu.memory_space<any>> -> memref<1x10x16x128xf32, #tpu.memory_space<any>>
    %5 = tpu.memref_squeeze %4 : memref<1x10x16x128xf32, #tpu.memory_space<any>> -> memref<10x16x128xf32, #tpu.memory_space<any>>
    tpu.wait_dma2 semaphore(%arg11 : memref<!tpu.dma_semaphore, #tpu.memory_space<semaphore_mem>>) src(%5 : memref<10x16x128xf32, #tpu.memory_space<any>>) dst(%arg10 : memref<10x16x128xf32, #tpu.memory_space<vmem>>)
    %c0 = arith.constant 0 : index
    %c0_3 = arith.constant 0 : index
    %c0_4 = arith.constant 0 : index
    %6 = vector.load %arg10[%c0, %c0_3, %c0_4] : memref<10x16x128xf32, #tpu.memory_space<vmem>>, vector<10x16x128xf32>
    %7 = vector.shape_cast %6 : vector<10x16x128xf32> to vector<160x128xf32>
    %8 = arith.truncf %7 : vector<160x128xf32> to vector<160x128xbf16>
    %c0_5 = arith.constant 0 : index
    %c0_6 = arith.constant 0 : index
    %9 = vector.load %arg3[%c0_5, %c0_6] : memref<128x32xbf16, #tpu.memory_space<vmem>>, vector<128x32xbf16>
    %cst = arith.constant dense<0.000000e+00> : vector<160x32xf32>
    %10 = tpu.matmul %8, %9, %cst {dimension_numbers = #tpu.dot_dimension_numbers<[1], [0], [0], [1], [0, 0, 1, 1], [], []>} : vector<160x128xbf16>, vector<128x32xbf16>, vector<160x32xf32> -> vector<160x32xf32>
    %c0_7 = arith.constant 0 : index
    %c0_8 = arith.constant 0 : index
    %11 = vector.load %arg4[%c0_7, %c0_8] : memref<1x32xf32, #tpu.memory_space<vmem>>, vector<1x32xf32>
    %12 = vector.broadcast %11 : vector<1x32xf32> to vector<160x32xf32>
    %13 = arith.addf %10, %12 : vector<160x32xf32>
    %cst_9 = arith.constant 0.000000e+00 : f32
    %14 = vector.broadcast %cst_9 : f32 to vector<160x32xf32>
    %15 = arith.maximumf %13, %14 : vector<160x32xf32>
    %16 = tpu.iota {dimensions = array<i32: 0>} : vector<10x16x1xi32>
    %17 = vector.shape_cast %16 : vector<10x16x1xi32> to vector<160x1xi32>
    %c8_i32_10 = arith.constant 8 : i32
    %18 = arith.muli %arg1, %c8_i32_10 : i32
    %19 = vector.broadcast %18 : i32 to vector<160x1xi32>
    %20 = arith.addi %17, %19 : vector<160x1xi32>
    %c1_i32 = arith.constant 1 : i32
    %21 = vector.broadcast %c1_i32 : i32 to vector<160x1xi32>
    %22 = arith.cmpi sge, %20, %21 : vector<160x1xi32>
    %c16_i32 = arith.constant 16 : i32
    %23 = vector.broadcast %c16_i32 : i32 to vector<160x1xi32>
    %24 = arith.cmpi sle, %20, %23 : vector<160x1xi32>
    %25 = arith.andi %22, %24 : vector<160x1xi1>
    %cst_11 = arith.constant 0.000000e+00 : f32
    %26 = vector.shape_cast %25 : vector<160x1xi1> to vector<160x1xi1>
    %27 = vector.broadcast %26 : vector<160x1xi1> to vector<160x32xi1>
    %28 = vector.broadcast %cst_11 : f32 to vector<160x32xf32>
    %29 = arith.select %27, %15, %28 : vector<160x32xi1>, vector<160x32xf32>
    %30 = tpu.iota {dimensions = array<i32: 1>} : vector<10x16x1xi32>
    %31 = vector.shape_cast %30 : vector<10x16x1xi32> to vector<160x1xi32>
    %cst_12 = arith.constant 0.000000e+00 : f32
    %32 = vector.broadcast %cst_12 : f32 to vector<1x32xf32>
    %c0_i32_13 = arith.constant 0 : i32
    %33 = vector.broadcast %c0_i32_13 : i32 to vector<160x1xi32>
    %34 = arith.cmpi eq, %31, %33 : vector<160x1xi32>
    %35 = vector.extract_strided_slice %29 {offsets = [0, 0], sizes = [159, 32], strides = [1, 1]} : vector<160x32xf32> to vector<159x32xf32>
    %36 = tpu.concatenate %32, %35 in 0 : vector<1x32xf32>, vector<159x32xf32> -> vector<160x32xf32>
    %cst_14 = arith.constant 0.000000e+00 : f32
    %37 = vector.shape_cast %34 : vector<160x1xi1> to vector<160x1xi1>
    %38 = vector.broadcast %37 : vector<160x1xi1> to vector<160x32xi1>
    %39 = vector.broadcast %cst_14 : f32 to vector<160x32xf32>
    %40 = arith.select %38, %39, %36 : vector<160x32xi1>, vector<160x32xf32>
    %c15_i32 = arith.constant 15 : i32
    %41 = vector.broadcast %c15_i32 : i32 to vector<160x1xi32>
    %42 = arith.cmpi eq, %31, %41 : vector<160x1xi32>
    %43 = vector.extract_strided_slice %29 {offsets = [1, 0], sizes = [159, 32], strides = [1, 1]} : vector<160x32xf32> to vector<159x32xf32>
    %44 = tpu.concatenate %43, %32 in 0 : vector<159x32xf32>, vector<1x32xf32> -> vector<160x32xf32>
    %cst_15 = arith.constant 0.000000e+00 : f32
    %45 = vector.shape_cast %42 : vector<160x1xi1> to vector<160x1xi1>
    %46 = vector.broadcast %45 : vector<160x1xi1> to vector<160x32xi1>
    %47 = vector.broadcast %cst_15 : f32 to vector<160x32xf32>
    %48 = arith.select %46, %47, %44 : vector<160x32xi1>, vector<160x32xf32>
    %49 = tpu.concatenate %40, %29, %48 in 1 : vector<160x32xf32>, vector<160x32xf32>, vector<160x32xf32> -> vector<160x96xf32>
    %50 = arith.truncf %49 : vector<160x96xf32> to vector<160x96xbf16>
    %51 = vector.extract_strided_slice %50 {offsets = [0, 0], sizes = [128, 96], strides = [1, 1]} : vector<160x96xbf16> to vector<128x96xbf16>
    %52 = vector.extract_strided_slice %50 {offsets = [16, 0], sizes = [128, 96], strides = [1, 1]} : vector<160x96xbf16> to vector<128x96xbf16>
    %53 = vector.extract_strided_slice %50 {offsets = [32, 0], sizes = [128, 96], strides = [1, 1]} : vector<160x96xbf16> to vector<128x96xbf16>
    %54 = tpu.concatenate %51, %52, %53 in 1 : vector<128x96xbf16>, vector<128x96xbf16>, vector<128x96xbf16> -> vector<128x288xbf16>
    %c0_16 = arith.constant 0 : index
    %c0_17 = arith.constant 0 : index
    %55 = vector.load %arg5[%c0_16, %c0_17] : memref<288x32xbf16, #tpu.memory_space<vmem>>, vector<288x32xbf16>
    %cst_18 = arith.constant dense<0.000000e+00> : vector<128x32xf32>
    %56 = tpu.matmul %54, %55, %cst_18 {dimension_numbers = #tpu.dot_dimension_numbers<[1], [0], [0], [1], [0, 0, 1, 1], [], []>} : vector<128x288xbf16>, vector<288x32xbf16>, vector<128x32xf32> -> vector<128x32xf32>
    %c0_19 = arith.constant 0 : index
    %c0_20 = arith.constant 0 : index
    %57 = vector.load %arg6[%c0_19, %c0_20] : memref<1x32xf32, #tpu.memory_space<vmem>>, vector<1x32xf32>
    %58 = vector.broadcast %57 : vector<1x32xf32> to vector<128x32xf32>
    %59 = arith.addf %56, %58 : vector<128x32xf32>
    %cst_21 = arith.constant 0.000000e+00 : f32
    %60 = vector.broadcast %cst_21 : f32 to vector<128x32xf32>
    %61 = arith.maximumf %59, %60 : vector<128x32xf32>
    %62 = arith.truncf %61 : vector<128x32xf32> to vector<128x32xbf16>
    %c0_22 = arith.constant 0 : index
    %c0_23 = arith.constant 0 : index
    %63 = vector.load %arg7[%c0_22, %c0_23] : memref<32x128xbf16, #tpu.memory_space<vmem>>, vector<32x128xbf16>
    %cst_24 = arith.constant dense<0.000000e+00> : vector<128x128xf32>
    %64 = tpu.matmul %62, %63, %cst_24 {dimension_numbers = #tpu.dot_dimension_numbers<[1], [0], [0], [1], [0, 0, 1, 1], [], []>} : vector<128x32xbf16>, vector<32x128xbf16>, vector<128x128xf32> -> vector<128x128xf32>
    %c0_25 = arith.constant 0 : index
    %c0_26 = arith.constant 0 : index
    %65 = vector.load %arg8[%c0_25, %c0_26] : memref<1x128xf32, #tpu.memory_space<vmem>>, vector<1x128xf32>
    %66 = vector.broadcast %65 : vector<1x128xf32> to vector<128x128xf32>
    %67 = arith.addf %64, %66 : vector<128x128xf32>
    %cst_27 = arith.constant 0.000000e+00 : f32
    %68 = vector.broadcast %cst_27 : f32 to vector<128x128xf32>
    %69 = arith.maximumf %67, %68 : vector<128x128xf32>
    %70 = vector.extract_strided_slice %7 {offsets = [16, 0], sizes = [128, 128], strides = [1, 1]} : vector<160x128xf32> to vector<128x128xf32>
    %71 = arith.addf %69, %70 : vector<128x128xf32>
    %cst_28 = arith.constant 0.000000e+00 : f32
    %72 = vector.broadcast %cst_28 : f32 to vector<128x128xf32>
    %73 = arith.maximumf %71, %72 : vector<128x128xf32>
    %74 = vector.shape_cast %73 : vector<128x128xf32> to vector<8x16x128xf32>
    %c0_29 = arith.constant 0 : index
    %c0_30 = arith.constant 0 : index
    %c0_31 = arith.constant 0 : index
    %c0_32 = arith.constant 0 : index
    %75 = vector.load %arg9[%c0_29, %c0_30, %c0_31, %c0_32] : memref<1x8x16x128xf32, #tpu.memory_space<vmem>>, vector<1x8x16x128xf32>
    %76 = vector.shape_cast %75 : vector<1x8x16x128xf32> to vector<8x16x128xf32>
    %77 = vector.shape_cast %74 : vector<8x16x128xf32> to vector<1x8x16x128xf32>
    tpu.vector_store %arg9[%c0_29, %c0_30, %c0_31, %c0_32], %77 {strides = array<i32>} : memref<1x8x16x128xf32, #tpu.memory_space<vmem>>, vector<1x8x16x128xf32>,
    return
  }
  func.func @transform_1(%arg0: i32, %arg1: i32) -> (i32, i32) {
    %c0_i32 = arith.constant 0 : i32
    %c0_i32_0 = arith.constant 0 : i32
    %c0_i32_1 = arith.constant 0 : i32
    return %c0_i32, %c0_i32_0 : i32, i32
  }
  func.func @transform_2(%arg0: i32, %arg1: i32) -> (i32, i32) {
    %c0_i32 = arith.constant 0 : i32
    %c0_i32_0 = arith.constant 0 : i32
    %c0_i32_1 = arith.constant 0 : i32
    return %c0_i32, %c0_i32_0 : i32, i32
  }
  func.func @transform_3(%arg0: i32, %arg1: i32) -> (i32, i32) {
    %c0_i32 = arith.constant 0 : i32
    %c0_i32_0 = arith.constant 0 : i32
    %c0_i32_1 = arith.constant 0 : i32
    return %c0_i32, %c0_i32_0 : i32, i32
  }
  func.func @transform_4(%arg0: i32, %arg1: i32) -> (i32, i32) {
    %c0_i32 = arith.constant 0 : i32
    %c0_i32_0 = arith.constant 0 : i32
    %c0_i32_1 = arith.constant 0 : i32
    return %c0_i32, %c0_i32_0 : i32, i32
  }
  func.func @transform_5(%arg0: i32, %arg1: i32) -> (i32, i32) {
    %c0_i32 = arith.constant 0 : i32
    %c0_i32_0 = arith.constant 0 : i32
    %c0_i32_1 = arith.constant 0 : i32
    return %c0_i32, %c0_i32_0 : i32, i32
  }
  func.func @transform_6(%arg0: i32, %arg1: i32) -> (i32, i32) {
    %c0_i32 = arith.constant 0 : i32
    %c0_i32_0 = arith.constant 0 : i32
    %c0_i32_1 = arith.constant 0 : i32
    return %c0_i32, %c0_i32_0 : i32, i32
  }
  func.func @transform_7(%arg0: i32, %arg1: i32) -> (i32, i32, i32, i32) {
    %c0_i32 = arith.constant 0 : i32
    %c0_i32_0 = arith.constant 0 : i32
    %c0_i32_1 = arith.constant 0 : i32
    return %arg0, %arg1, %c0_i32, %c0_i32_0 : i32, i32, i32, i32
  }
}

</mosaic_0001>

<bundles_post_ra>
// kernel: bottleneck_forward.1
= control target key start
LH: loop header
LB: loop body
LE: loop exit
PB: predicated region body
PF: predicated region fallthrough
CT: control target
= control target key end

     0   :  { %12 = vsyncpa [#allocation5], 0  ;;  %s3385_s0 = inlined_call_operand.vmem [shape: f32[2,18,16,128], index: 0, kind: input, shape index: {}]   ;;  %s3386_s1 = inlined_call_operand.vmem [shape: bf16[128,32], index: 1, kind: input, shape index: {}]   ;;  %s3387_s2 = inlined_call_operand.vmem [shape: f32[1,32], index: 2, kind: input, shape index: {}]   ;;  %s3388_s3 = inlined_call_operand.vmem [shape: bf16[288,32], index: 3, kind: input, shape index: {}]   ;;  %s3389_s4 = inlined_call_operand.vmem [shape: f32[1,32], index: 4, kind: input, shape index: {}]   ;;  %s3390_s5 = inlined_call_operand.vmem [shape: bf16[32,128], index: 5, kind: input, shape index: {}]   ;;  %s3391_s6 = inlined_call_operand.vmem [shape: f32[1,128], index: 6, kind: input, shape index: {}]   ;;  %s3392_s7 = inlined_call_operand.hbm [shape: f32[2,16,16,128], index: 7, kind: output, shape index: {}]  }
   0x1   :  { %14 = vsyncpa [#allocation5 + $0x1], 0  ;;  %s2435_s24 = smov 0   ;;  %s2437_s25 = smov 0  }
   0x2   :  { %s2439_s26 = smov 0   ;;  %s2441_s27 = smov 0  }
   0x3   :  { %s2443_s28 = smov 0   ;;  %s2445_s29 = smov 0  }
   0x4   :  { %s2447_s30 = smov 0   ;;  %s2449_s8 = smov 0  }
   0x5 LB: > { %s1829_s9 = sadd.s32 4294967295, %s2387_s8   ;;  %s1830_s10 = sadd.s32 4294967294, %s2387_s8   ;;  %s2387_s8 = sphi %s2449_s8, %s20_s8   ;;  %s2383_s30 = sphi %s2447_s30, %s3467_s30   ;;  %s2379_s29 = sphi %s2445_s29, %s3466_s29   ;;  %s2375_s28 = sphi %s2443_s28, %s3465_s28   ;;  %s2371_s27 = sphi %s2441_s27, %s3464_s27   ;;  %s2367_s26 = sphi %s2439_s26, %s3463_s26   ;;  %s2363_s25 = sphi %s2437_s25, %s3462_s25   ;;  %s2359_s24 = sphi %s2435_s24, %s3461_s24  }
   0x6   : > { %s29_s11 = sadd.s32 1, %s2379_s29  ;;  %s32_s12 = sadd.s32 1, %s2383_s30 }
   0x7   : > { %p30_p0 = scmp.ge.s32.totalorder %s29_s11, 2  ;;  %p177_p1 = scmp.ne.s32.totalorder %s2367_s26, %s2363_s25 }
   0x8   : > { %p178_p2 = scmp.eq.s32.totalorder %s1829_s9, 3  ;;  %p183_p5 = scmp.ne.s32.totalorder %s2363_s25, %s2359_s24 }
   0x9   : > { %s3469_s11 = smov (%p30_p0, %s29_s11), 0  ;;  %s3471_s12 = smov (!%p30_p0, %s32_s12), %s2383_s30 }
   0xa   : > { %3401 = sst [smem:[#allocation9_spill]] %s3469_s11  ;;  %s163_s13 = ssub.s32 %s2379_s29, %s3469_s11 }
   0xb   : > { %p2486_p3 = por %p178_p2, %p177_p1  ;;  %p34_p4 = scmp.ge.s32.totalorder %s3471_s12, 2 }
   0xc   : > { %p184_p6 = scmp.eq.s32.totalorder %s1830_s10, 3  ;;  %p1832_p7 = scmp.ge.s32.totalorder %s2387_s8, 1 }
   0xd   : > { %s3473_s12 = smov (%p34_p4, %s3471_s12), 0  ;;  %p220_p9 = scmp.lt.s32.totalorder %s2387_s8, 5 }
   0xe   : > { %3403 = sst [smem:[#allocation10_spill]] %s3473_s12  ;;  %p2495_p8 = por %p184_p6, %p183_p5 }
   0xf   : > { %s162_s16 = ssub.s32 %s2383_s30, %s3473_s12  ;;  %s167_s17 = sadd.s32 1, %s2367_s26 }
  0x10   : > { %s164_s18 = sor.u32 %s163_s13, %s162_s16  ;;  %p221_p10 = pnand %p1832_p7, %p220_p9 }
  0x11   : > { %p165_p11 = scmp.eq.s32.totalorder %s164_s18, 0 }
  0x12   : > { %224 = sbr.rel (%p221_p10) target bundleno = 1062 (0x426), region = 44 }
  0x13   : > { %s2504_s19 = scalar_select %p165_p11, %s2367_s26, %s167_s17  }
  0x19   : > { %s242_s20 = sand.u32 1, %s2363_s25   ;;  %s1834_s21 = sshll.u32 %s2371_s27, 3 }
  0x1a   : > { %s1833_s22 = sshll.u32 %s242_s20, 7  ;;  %s1891_s23 = sshll.u32 %s2371_s27, 7 }
  0x1b   : > { %s249_s9 = smul.u32 288, %s2375_s28  ;;  %s2547_s11 = scalar_lea.vmem [#allocation4], %s1833_s22 }
  0x1d   : > { %s250_s10 = sadd.s32 %s1891_s23, %s249_s9 }
  0x1e   : > { %s251_s13 = scalar_lea.vmem %s3385_s0, %s250_s10 }
  0x1f   : > { %v284_v0 = vld [vmem:[%s251_s13] sm:$0xff]  ;;  %v286_v1 = vld [vmem:[%s251_s13 + $0x8] sm:$0xff]  ;;  %v2515_v2 = vld [vmem:[%s251_s13 + $0x10] sm:$0xff] }
  0x20   : > { %v2517_v3 = vld [vmem:[%s251_s13 + $0x18] sm:$0xff]  ;;  %v2519_v4 = vld [vmem:[%s251_s13 + $0x20] sm:$0xff]  ;;  %v2521_v5 = vld [vmem:[%s251_s13 + $0x28] sm:$0xff] }
  0x21   : > { %v2523_v6 = vld [vmem:[%s251_s13 + $0x30] sm:$0xff]  ;;  %v2525_v7 = vld [vmem:[%s251_s13 + $0x38] sm:$0xff]  ;;  %v2527_v8 = vld [vmem:[%s251_s13 + $0x40] sm:$0xff] }
  0x22   : > { %v2529_v9 = vld [vmem:[%s251_s13 + $0x48] sm:$0xff]  ;;  %v2531_v10 = vld [vmem:[%s251_s13 + $0x50] sm:$0xff]  ;;  %v2533_v11 = vld [vmem:[%s251_s13 + $0x58] sm:$0xff] }
  0x23   : > { %3405 = vst [vmem:[#allocation11_spill] sm:$0xff] %v2533_v11  ;;  %v2535_v12 = vld [vmem:[%s251_s13 + $0x60] sm:$0xff]  ;;  %v2537_v13 = vld [vmem:[%s251_s13 + $0x68] sm:$0xff]  ;;  %v2539_v14 = vld [vmem:[%s251_s13 + $0x70] sm:$0xff] }
  0x24   : > { %3406 = vst [vmem:[#allocation12_spill] sm:$0xff] %v2539_v14  ;;  %v2541_v15 = vld [vmem:[%s251_s13 + $0x78] sm:$0xff]  ;;  %v2543_v16 = vld [vmem:[%s251_s13 + $0x80] sm:$0xff]  ;;  %v2545_v17 = vld [vmem:[%s251_s13 + $0x88] sm:$0xff] }
  0x25   : > { %3407 = vst [vmem:[#allocation13_spill] sm:$0xff] %v2541_v15  ;;  %3408 = vst [vmem:[#allocation14_spill] sm:$0xff] %v2543_v16  ;;  %v320_v18 = vld [vmem:[%s251_s13 + $0x90] sm:$0xff]  ;;  %v322_v19 = vld [vmem:[%s251_s13 + $0x98] sm:$0xff] }
  0x26   : > { %3409 = vst [vmem:[#allocation15_spill] sm:$0xff] %v2545_v17 }
  0x27   : > { %331 = vsyncadd [#allocation3], 2560 }
  0x28   : > { %2351 = dma.done.wait [#allocation3], 2560 }
  0x29   : > { %2352 = vsyncadd [#allocation3], 4294964736  ;;  %v356_v20 = vpack.c.bf16 %v286_v1, %v284_v0  ;;  %v2263_v21 = vld [vmem:[%s3386_s1] sm:$0xff]   ;;  %v2264_v22 = vld [vmem:[%s3386_s1 + $0x8] sm:$0xff]   ;;  %v357_v29 = vpack.c.bf16 %v2517_v3, %v2515_v2  ;;  %v358_v30 = vpack.c.bf16 %v2521_v5, %v2519_v4  ;;  %v359_v31 = vpack.c.bf16 %v2525_v7, %v2523_v6  ;;  %s2390_s12 = smov 64   ;;  %s2391_s16 = smov 96  }
  0x2a   : > { %1995 = vmatprep.subr.bf16.mxu0 %v2263_v21  ;;  %v2265_v23 = vld [vmem:[%s3386_s1 + $0x10] sm:$0xff]   ;;  %v2266_v24 = vld [vmem:[%s3386_s1 + $0x18] sm:$0xff]   ;;  %v2267_v25 = vld [vmem:[%s3386_s1 + $0x20] sm:$0xff]   ;;  %v360_v32 = vpack.c.bf16 %v2529_v9, %v2527_v8  ;;  %v361_v33 = vpack.c.bf16 %v2533_v11, %v2531_v10  ;;  %v362_v34 = vpack.c.bf16 %v2537_v13, %v2535_v12  ;;  %v363_v35 = vpack.c.bf16 %v2541_v15, %v2539_v14  ;;  %s1886_s23 = sshll.u32 %s2375_s28, 5  ;;  %s3333_s13 = scalar_lea.sflag [#allocation5], %s242_s20 }
  0x2b   : > { %2011 = vmatprep.mubr.bf16.mxu0 %v356_v20  ;;  %1996 = vmatpush3.bf16.msra.mxu0 %v2263_v21  ;;  %v2268_v26 = vld [vmem:[%s3386_s1 + $0x28] sm:$0xff]   ;;  %v2269_v27 = vld [vmem:[%s3386_s1 + $0x30] sm:$0xff]   ;;  %v2270_v28 = vld [vmem:[%s3386_s1 + $0x38] sm:$0xff]   ;;  %v364_v36 = vpack.c.bf16 %v2545_v17, %v2543_v16  ;;  %v365_v37 = vpack.c.bf16 %v322_v19, %v320_v18  ;;  %v570_v38 = vstv %s1834_s21  ;;  %v650_v39 = vlaneseq  ;;  %s2389_s21 = smov 32   ;;  %s2392_s17 = smov [#allocation4]  }
  0x2c   : > { %1997 = vmatprep.subr.bf16.mxu0 %v2264_v22  ;;  %v571_v40 = vadd.s32 1, %v570_v38  ;;  %v2596_v42 = vld [vmem:[%s3387_s2] ss:$0 sm:$0xff]  ;;  %v573_v43 = vadd.s32 3, %v570_v38  ;;  %v572_v44 = vadd.s32 2, %v570_v38  ;;  %vm580_vm2 = vcmp.ge.s32.totalorder %v570_v38, 1 }
  0x2d   : > { %v2591_v41 = vshrl.u32 %v650_v39, 7  ;;  %vm590_vm3 = vcmp.le.s32.totalorder %v570_v38, 16  ;;  %vm675_vm5 = vcmask 1040384   ;;  %vm762_vm6 = vcmask 1046528   ;;  %s2295_s18 = sshll.u32 %s2392_s17, 4  ;;  %s2296_s18 = int_to_ptr.vmem [resolvable:$false] %s2295_s18 }
  0x2e   : > { %vm581_vm0 = vcmp.ge.s32.totalorder %v571_v40, 1  ;;  %vm591_vm1 = vcmp.le.s32.totalorder %v571_v40, 16  ;;  %vm583_vm8 = vcmp.ge.s32.totalorder %v573_v43, 1  ;;  %vm593_vm9 = vcmp.le.s32.totalorder %v573_v43, 16  ;;  %vm2609_vm11 = vmand %vm580_vm2, %vm590_vm3 }
  0x2f   : > { %1998 = vmatpush3.bf16.msra.mxu0 %v2264_v22  ;;  %v2599_v46 = vadd.s32 8, %v2591_v41  ;;  %vm653_vm4 = vcmp.eq.s32.totalorder %v2591_v41, 0  ;;  %vm2603_vm7 = vmand %vm581_vm0, %vm591_vm1  ;;  %vm582_vm10 = vcmp.ge.s32.totalorder %v572_v44, 1  ;;  %vm592_vm12 = vcmp.le.s32.totalorder %v572_v44, 16  ;;  %v2273_v41 = vld [vmem:[%s3388_s3 + $0x48] sm:$0xff]  }
  0x30   : > { %1999 = vmatprep.subr.bf16.mxu0 %v2265_v23  ;;  %v2614_v56 = vadd.s32 5, %v570_v38  ;;  %v2617_v59 = vadd.s32 4, %v570_v38  ;;  %v2620_v60 = vadd.s32 6, %v570_v38  ;;  %v2626_v63 = vadd.s32 7, %v570_v38  ;;  %vm2666_vm2 = vmand %vm583_vm8, %vm593_vm9 }
  0x31   : > { %vm761_vm13 = vcmp.eq.s32.totalorder %v2599_v46, 15  ;;  %v2628_v0 = vadd.s32 9, %v570_v38  ;;  %v2635_v20 = vadd.s32 8, %v570_v38  ;;  %vm2679_vm3 = vmand %vm582_vm10, %vm592_vm12 }
  0x32   : > { %vm585_vm14 = vcmp.ge.s32.totalorder %v2614_v56, 1  ;;  %vm595_vm15 = vcmp.le.s32.totalorder %v2614_v56, 16  ;;  %vm584_vm0 = vcmp.ge.s32.totalorder %v2617_v59, 1  ;;  %vm594_vm1 = vcmp.le.s32.totalorder %v2617_v59, 16 }
  0x33   : > { %2000 = vmatpush3.bf16.msra.mxu0 %v2265_v23  ;;  %vm597_vm8 = vcmp.le.s32.totalorder %v2626_v63, 16  ;;  %vm586_vm9 = vcmp.ge.s32.totalorder %v2620_v60, 1  ;;  %vm596_vm10 = vcmp.le.s32.totalorder %v2620_v60, 16  ;;  %vm2749_vm12 = vmand %vm584_vm0, %vm594_vm1  ;;  %vm588_vm0 = vcmp.ge.s32.totalorder %v2635_v20, 1 }
  0x34   : > { %2001 = vmatprep.subr.bf16.mxu0 %v2266_v24  ;;  %vm598_vm1 = vcmp.le.s32.totalorder %v2635_v20, 16 }
  0x37   : > { %2002 = vmatpush3.bf16.msra.mxu0 %v2266_v24 }
  0x38   : > { %2003 = vmatprep.subr.bf16.mxu0 %v2267_v25 }
  0x3b   : > { %2004 = vmatpush3.bf16.msra.mxu0 %v2267_v25 }
  0x3c   : > { %2005 = vmatprep.subr.bf16.mxu0 %v2268_v26 }
  0x3f   : > { %2006 = vmatpush3.bf16.msra.mxu0 %v2268_v26 }
  0x40   : > { %2007 = vmatprep.subr.bf16.mxu0 %v2269_v27 }
  0x43   : > { %2008 = vmatpush3.bf16.msra.mxu0 %v2269_v27 }
  0x44   : > { %2009 = vmatprep.subr.bf16.mxu0 %v2270_v28 }
  0x47   : > { %2010 = vmatpush3.bf16.msra.mxu0 %v2270_v28 }
  0x4a   : > { %2012 = vmatmul.mubr.bf16.vlgmr.msra.gmra.mrb[0].mxu0 %v357_v29 }
  0x4b   : > { %2015 = vmatprep.mubr.bf16.mxu0 %v358_v30 }
  0x52   : > { %2016 = vmatmul.mubr.bf16.gmra.mrb[4].mxu0 %v359_v31 }
  0x53   : > { %2019 = vmatprep.mubr.bf16.mxu0 %v360_v32 }
  0x5a   : > { %2020 = vmatmul.mubr.bf16.gmra.mrb[8].mxu0 %v361_v33 }
  0x5b   : > { %2023 = vmatprep.mubr.bf16.mxu0 %v362_v34 }
  0x62   : > { %2024 = vmatmul.mubr.bf16.gmra.mrb[12].mxu0 %v363_v35 }
  0x63   : > { %2027 = vmatprep.mubr.bf16.mxu0 %v364_v36 }
  0x6a   : > { %2028 = vmatmul.mubr.bf16.gmra.mrb[16].mxu0 %v365_v37 }
 0x11d   : > { %v2013_v45 = vpop.f32.mrb[0].mxu0 }
 0x11e   : > { %v480_v47 = vadd.f32 %v2013_v45, %v2596_v42  ;;  %v471_v48 = vpop.f32.mrb[1].mxu0 }
 0x11f   : > { %v472_v50 = vadd.f32 %v2596_v42, %v471_v48  ;;  %v2014_v51 = vpop.f32.mrb[2].mxu0 }
 0x120   : > { %v552_v52 = vmax.f32 %v480_v47, 0.0  ;;  %v483_v54 = vadd.f32 %v2014_v51, %v2596_v42  ;;  %v474_v55 = vpop.f32.mrb[3].mxu0 }
 0x121   : > { %v550_v57 = vmax.f32 %v472_v50, 0.0  ;;  %v475_v58 = vadd.f32 %v2596_v42, %v474_v55 }
 0x122   : > { %v2624_v61 = vsel %vm2603_vm7, %v552_v52, 0.0  ;;  %v553_v62 = vmax.f32 %v483_v54, 0.0 }
 0x123   : > { %v679_v1 = vrot.slane %v2624_v61, 7  ;;  %v2633_v18 = vsel %vm2609_vm11, %v550_v57, 0.0  ;;  %v551_v19 = vmax.f32 %v475_v58, 0.0  ;;  %v766_v21 = vrot.slane %v2624_v61, 1 }
 0x124   : > { %v676_v22 = vrot.slane %v2633_v18, 7  ;;  %v763_v23 = vrot.slane %v2633_v18, 1  ;;  %v2642_v24 = vsel %vm2603_vm7, %v553_v62, 0.0  ;;  %vm587_vm7 = vcmp.ge.s32.totalorder %v2626_v63, 1 }
 0x125   : > { %v681_v25 = vrot.slane %v2642_v24, 7  ;;  %v768_v26 = vrot.slane %v2642_v24, 1  ;;  %v2650_v27 = vsel %vm2609_vm11, %v551_v19, 0.0  ;;  %v2017_v28 = vpop.f32.mrb[4].mxu0  ;;  %vm2735_vm11 = vmand %vm585_vm14, %vm595_vm15  ;;  %vm589_vm14 = vcmp.ge.s32.totalorder %v2628_v0, 1 }
 0x126   : > { %v735_v30 = vsel %vm675_vm5, 0.0, %v676_v22  ;;  %v677_v31 = vrot.slane %v2650_v27, 7  ;;  %v764_v32 = vrot.slane %v2650_v27, 1  ;;  %v496_v33 = vadd.f32 %v2017_v28, %v2596_v42  ;;  %v487_v34 = vpop.f32.mrb[5].mxu0 }
 0x127   : > { %v2662_v35 = vsel %vm653_vm4, 0.0, %v735_v30  ;;  %v488_v37 = vadd.f32 %v2596_v42, %v487_v34  ;;  %v2018_v38 = vpop.f32.mrb[6].mxu0  ;;  %v2672_v39 = vsel %vm762_vm6, %v766_v21, %v768_v26  ;;  %v2675_v40 = vsel %vm675_vm5, %v679_v1, %v681_v25 }
 0x128   : > { %v556_v45 = vmax.f32 %v496_v33, 0.0  ;;  %v499_v43 = vadd.f32 %v2018_v38, %v2596_v42  ;;  %v490_v48 = vpop.f32.mrb[7].mxu0  ;;  %v680_v49 = vsel %vm675_vm5, %v677_v31, %v679_v1  ;;  %v2693_v44 = vsel %vm762_vm6, %v763_v23, %v764_v32 }
 0x129   : > { %v554_v51 = vmax.f32 %v488_v37, 0.0  ;;  %v491_v52 = vadd.f32 %v2596_v42, %v490_v48  ;;  %v2690_v53 = vsel %vm653_vm4, 0.0, %v680_v49  ;;  %v767_v57 = vsel %vm762_vm6, %v764_v32, %v766_v21 }
 0x12a   : > { %v2697_v54 = vsel %vm2666_vm2, %v556_v45, 0.0  ;;  %v557_v55 = vmax.f32 %v499_v43, 0.0  ;;  %v2701_v58 = vsel %vm675_vm5, %v676_v22, %v677_v31  ;;  %v2715_v21 = vsel %vm761_vm13, 0.0, %v767_v57 }
 0x12b   : > { %v774_v1 = vrot.slane %v2697_v54, 1  ;;  %v634_v19 = vsel %vm2679_vm3, %v554_v51, 0.0  ;;  %v555_v28 = vmax.f32 %v491_v52, 0.0  ;;  %vm599_vm15 = vcmp.le.s32.totalorder %v2628_v0, 16 }
 0x12c   : > { %v683_v23 = vrot.slane %v634_v19, 7  ;;  %v770_v30 = vrot.slane %v634_v19, 1  ;;  %v2709_v33 = vsel %vm2666_vm2, %v557_v55, 0.0  ;;  %vm2810_vm2 = vmand %vm587_vm7, %vm597_vm8  ;;  %v3434_v16 = vrot.slane %v2697_v54, 7 }
 0x12d   : > { %v776_v31 = vrot.slane %v2709_v33, 1  ;;  %v2721_v32 = vsel %vm2679_vm3, %v555_v28, 0.0  ;;  %v2021_v34 = vpop.f32.mrb[8].mxu0  ;;  %v2168_v36 = vpack.i.bf16 %v2709_v33, %v2697_v54  ;;  %vm2825_vm3 = vmand %vm586_vm9, %vm596_vm10  ;;  %v3433_v14 = vrot.slane %v2709_v33, 7 }
 0x12e   : > { %v3395_v37 = vrot.slane %v2721_v32, 7  ;;  %v772_v38 = vrot.slane %v2721_v32, 1  ;;  %v512_v45 = vadd.f32 %v2021_v34, %v2596_v42  ;;  %v503_v43 = vpop.f32.mrb[9].mxu0  ;;  %v2163_v48 = vpack.i.bf16 %v2721_v32, %v634_v19  ;;  %vm2878_vm7 = vmand %vm589_vm14, %vm599_vm15 }
 0x12f   : > { %v504_v49 = vadd.f32 %v2596_v42, %v503_v43  ;;  %v2022_v51 = vpop.f32.mrb[10].mxu0  ;;  %v2741_v52 = vsel %vm762_vm6, %v774_v1, %v776_v31  ;;  %v771_v55 = vsel %vm762_vm6, %v768_v26, %v770_v30  ;;  %v684_v57 = vsel %vm675_vm5, %v681_v25, %v683_v23  ;;  %vm2895_vm8 = vmand %vm588_vm0, %vm598_vm1 }
 0x130   : > { %v560_v28 = vmax.f32 %v512_v45, 0.0  ;;  %v515_v19 = vadd.f32 %v2022_v51, %v2596_v42  ;;  %v506_v34 = vpop.f32.mrb[11].mxu0  ;;  %2164 = vrot.lane.b32.xlu0 %v2163_v48, %s2389_s21  ;;  %v773_v43 = vsel %vm762_vm6, %v770_v30, %v772_v38  ;;  %v775_v26 = vsel %vm762_vm6, %v772_v38, %v774_v1 }
 0x131   : > { %v558_v25 = vmax.f32 %v504_v49, 0.0  ;;  %v507_v45 = vadd.f32 %v2596_v42, %v506_v34  ;;  %v832_v59 = vsel %vm761_vm13, 0.0, %v775_v26  ;;  %v2762_v50 = vsel %vm761_vm13, 0.0, %v771_v55 }
 0x132   : > { %v2766_v51 = vsel %vm2735_vm11, %v560_v28, 0.0  ;;  %v561_v22 = vmax.f32 %v515_v19, 0.0  ;;  %v2173_v48 = vpack.i.bf16 %v832_v59, %v773_v43  ;;  %v2789_v19 = vsel %vm675_vm5, %v683_v23, %v3395_v37 }
 0x133   : > { %v782_v38 = vrot.slane %v2766_v51, 1  ;;  %v2774_v49 = vsel %vm2749_vm12, %v558_v25, 0.0  ;;  %v559_v34 = vmax.f32 %v507_v45, 0.0  ;;  %v3427_v17 = vrot.slane %v2721_v32, 7 }
 0x134   : > { %v778_v26 = vrot.slane %v2774_v49, 1  ;;  %v2780_v28 = vsel %vm2735_vm11, %v561_v22, 0.0  ;;  %2169 = vrot.lane.b32.xlu0 %v2168_v36, %s2389_s21  ;;  %2174 = vrot.lane.b32.xlu1 %v2173_v48, %s2390_s12  ;;  %v2912_v11 = vsel %vm675_vm5, %v3434_v16, %v3433_v14  ;;  %v3436_v0 = vrot.slane %v2774_v49, 7 }
 0x135   : > { %v784_v47 = vrot.slane %v2780_v28, 1  ;;  %v2795_v22 = vsel %vm2749_vm12, %v559_v34, 0.0  ;;  %v2025_v36 = vpop.f32.mrb[12].mxu0  ;;  %v2193_v25 = vpack.i.bf16 %v2780_v28, %v2766_v51 }
 0x136   : > { %v780_v23 = vrot.slane %v2795_v22, 1  ;;  %v528_v59 = vadd.f32 %v2025_v36, %v2596_v42  ;;  %v519_v48 = vpop.f32.mrb[13].mxu0  ;;  %v2183_v56 = vpack.i.bf16 %v2795_v22, %v2774_v49  ;;  %v779_v45 = vsel %vm762_vm6, %v776_v31, %v778_v26 }
 0x137   : > { %v520_v43 = vadd.f32 %v2596_v42, %v519_v48  ;;  %v2026_v1 = vpop.f32.mrb[14].mxu0  ;;  %v785_v55 = vsel %vm762_vm6, %v782_v38, %v784_v47  ;;  %v2819_v36 = vsel %vm653_vm4, 0.0, %v684_v57  ;;  %v834_v31 = vsel %vm761_vm13, 0.0, %v779_v45 }
 0x138   : > { %v564_v30 = vmax.f32 %v528_v59, 0.0  ;;  %2184 = vrot.lane.b32.xlu0 %v2183_v56, %s2389_s21  ;;  %v531_v48 = vadd.f32 %v2026_v1, %v2596_v42  ;;  %v522_v29 = vpop.f32.mrb[15].mxu0  ;;  %v781_v57 = vsel %vm762_vm6, %v778_v26, %v780_v23  ;;  %v2178_v59 = vpack.i.bf16 %v834_v31, %v2741_v52 }
 0x139   : > { %v562_v37 = vmax.f32 %v520_v43, 0.0  ;;  %v523_v62 = vadd.f32 %v2596_v42, %v522_v29  ;;  %v783_v60 = vsel %vm762_vm6, %v780_v23, %v782_v38  ;;  %v3426_v45 = vrot.slane %v2697_v54, 7 }
 0x13a   : > { %v2839_v15 = vsel %vm2810_vm2, %v564_v30, 0.0  ;;  %v565_v56 = vmax.f32 %v531_v48, 0.0  ;;  %v836_v1 = vsel %vm761_vm13, 0.0, %v783_v60  ;;  %2179 = vrot.lane.b32.xlu1 %v2178_v59, %s2390_s12 }
 0x13b   : > { %v688_v26 = vsel %vm675_vm5, %v3427_v17, %v3426_v45  ;;  %v790_v29 = vrot.slane %v2839_v15, 1  ;;  %v2852_v38 = vsel %vm2825_vm3, %v562_v37, 0.0  ;;  %v563_v30 = vmax.f32 %v523_v62, 0.0 }
 0x13c   : > { %v786_v23 = vrot.slane %v2852_v38, 1  ;;  %v2859_v32 = vsel %vm2810_vm2, %v565_v56, 0.0  ;;  %2194 = vrot.lane.b32.xlu0 %v2193_v25, %s2389_s21  ;;  %v2188_v17 = vpack.i.bf16 %v836_v1, %v781_v57 }
 0x13d   : > { %v792_v31 = vrot.slane %v2859_v32, 1  ;;  %v2866_v37 = vsel %vm2825_vm3, %v563_v30, 0.0  ;;  %v2029_v62 = vpop.f32.mrb[16].mxu0  ;;  %v2223_v59 = vpack.i.bf16 %v2859_v32, %v2839_v15 }
 0x13e   : > { %v788_v34 = vrot.slane %v2866_v37, 1  ;;  %v544_v56 = vadd.f32 %v2029_v62, %v2596_v42  ;;  %v535_v25 = vpop.f32.mrb[17].mxu0  ;;  %v787_v57 = vsel %vm762_vm6, %v784_v47, %v786_v23  ;;  %2189 = vrot.lane.b32.xlu1 %v2188_v17, %s2390_s12  ;;  %v2213_v62 = vpack.i.bf16 %v2866_v37, %v2852_v38 }
 0x13f   : > { %v536_v1 = vadd.f32 %v2596_v42, %v535_v25  ;;  %v838_v45 = vsel %vm761_vm13, 0.0, %v787_v57  ;;  %v2030_v30 = vpop.f32.mrb[18].mxu0  ;;  %v2889_v47 = vsel %vm762_vm6, %v790_v29, %v792_v31  ;;  %v3432_v17 = vpack.i.bf16 %v2642_v24, %v2624_v61 }
 0x140   : > { %v568_v48 = vmax.f32 %v544_v56, 0.0  ;;  %v2203_v25 = vpack.i.bf16 %v838_v45, %v785_v55  ;;  %v547_v57 = vadd.f32 %v2030_v30, %v2596_v42  ;;  %v538_v52 = vpop.f32.mrb[19].mxu0  ;;  %v789_v60 = vsel %vm762_vm6, %v786_v23, %v788_v34 }
 0x141   : > { %2199 = vrot.lane.b32.xlu0 %v3432_v17, %s2389_s21  ;;  %v566_v56 = vmax.f32 %v536_v1, 0.0  ;;  %v539_v43 = vadd.f32 %v2596_v42, %v538_v52  ;;  %v791_v20 = vsel %vm762_vm6, %v788_v34, %v790_v29  ;;  %v2920_v23 = vsel %vm653_vm4, 0.0, %v688_v26 }
 0x142   : > { %v648_v61 = vsel %vm2878_vm7, %v568_v48, 0.0  ;;  %v569_v24 = vmax.f32 %v547_v57, 0.0  ;;  %v840_v55 = vsel %vm761_vm13, 0.0, %v791_v20  ;;  %2204 = vrot.lane.b32.xlu1 %v2203_v25, %s2390_s12  ;;  %v3437_v20 = vrot.slane %v2709_v33, 7 }
 0x143   : > { %v711_v42 = vrot.slane %v648_v61, 7  ;;  %v798_v52 = vrot.slane %v648_v61, 1  ;;  %v646_v29 = vsel %vm2895_vm8, %v566_v56, 0.0  ;;  %v567_v14 = vmax.f32 %v539_v43, 0.0 }
 0x144   : > { %v707_v16 = vrot.slane %v646_v29, 7  ;;  %v794_v54 = vrot.slane %v646_v29, 1  ;;  %v649_v48 = vsel %vm2878_vm7, %v569_v24, 0.0  ;;  %v2218_v34 = vpack.i.bf16 %v840_v55, %v789_v60 }
 0x145   : > { %2214 = vrot.lane.b32.xlu0 %v2213_v62, %s2389_s21  ;;  %v713_v1 = vrot.slane %v649_v48, 7  ;;  %v800_v45 = vrot.slane %v649_v48, 1  ;;  %v647_v26 = vsel %vm2895_vm8, %v567_v14, 0.0  ;;  %v2243_v30 = vpack.i.bf16 %v649_v48, %v648_v61 }
 0x146   : > { %v709_v17 = vrot.slane %v647_v26, 7  ;;  %v796_v57 = vrot.slane %v647_v26, 1  ;;  %v2233_v56 = vpack.i.bf16 %v647_v26, %v646_v29  ;;  %v795_v25 = vsel %vm762_vm6, %v792_v31, %v794_v54 }
 0x147   : > { %v3435_v43 = vpack.i.bf16 %v2762_v50, %v2672_v39  ;;  %v842_v63 = vsel %vm761_vm13, 0.0, %v795_v25  ;;  %v801_v60 = vsel %vm762_vm6, %v798_v52, %v800_v45  ;;  %v822_v62 = vsel %vm762_vm6, %v800_v45, 0.0 }
 0x148   : > { %v692_v61 = vsel %vm675_vm5, %v3437_v20, %v3436_v0  ;;  %v2228_v31 = vpack.i.bf16 %v842_v63, %v2889_v47  ;;  %v797_v39 = vsel %vm762_vm6, %v794_v54, %v796_v57  ;;  %v799_v50 = vsel %vm762_vm6, %v796_v57, %v798_v52 }
 0x149   : > { %2209 = vrot.lane.b32.xlu1 %v3435_v43, %s2390_s12  ;;  %2224 = vrot.lane.b32.xlu0 %v2223_v59, %s2389_s21  ;;  %v846_v24 = vsel %vm761_vm13, 0.0, %v822_v62  ;;  %v844_v55 = vsel %vm761_vm13, 0.0, %v799_v50  ;;  %v3438_v14 = vrot.slane %v2795_v22, 7  ;;  %v3439_v33 = vmov %v3436_v0 }
 0x14a   : > { %v2248_v29 = vpack.i.bf16 %v846_v24, %v801_v60  ;;  %v2961_v59 = vsel %vm653_vm4, 0.0, %v692_v61  ;;  %v2238_v47 = vpack.i.bf16 %v844_v55, %v797_v39  ;;  %v3440_v52 = vrot.slane %v2766_v51, 7 }
 0x14b   : > { %v2957_v48 = vsel %vm675_vm5, %v3439_v33, %v3438_v14  ;;  %v3441_v54 = vmov %v3438_v14  ;;  %v3442_v45 = vrot.slane %v2780_v28, 7  ;;  %v3444_v25 = vrot.slane %v2852_v38, 7 }
 0x14c   : > { %v696_v46 = vsel %vm675_vm5, %v3441_v54, %v3440_v52  ;;  %v3443_v26 = vmov %v3440_v52  ;;  %v3446_v63 = vrot.slane %v2866_v37, 7  ;;  %v3448_v62 = vrot.slane %v2839_v15, 7  ;;  %v2281_v52 = vld [vmem:[%s3388_s3 + $0x68] sm:$0xff]  }
 0x14d   : > { %v2973_v49 = vsel %vm675_vm5, %v3443_v26, %v3442_v45  ;;  %2219 = vrot.lane.b32.xlu1 %v2218_v34, %s2390_s12  ;;  %v2978_v57 = vsel %vm653_vm4, 0.0, %v696_v46  ;;  %v3445_v43 = vmov %v3442_v45  ;;  %v3447_v60 = vmov %v3444_v25  ;;  %2234 = vrot.lane.b32.xlu0 %v2233_v56, %s2389_s21  ;;  %v2282_v54 = vld [vmem:[%s3388_s3 + $0x28] sm:$0xff]   ;;  %v2283_v46 = vld [vmem:[%s3388_s3 + $0x70] sm:$0xff]  }
 0x14e   : > { %v700_v22 = vsel %vm675_vm5, %v3445_v43, %v3444_v25  ;;  %v2990_v51 = vsel %vm675_vm5, %v3447_v60, %v3446_v63  ;;  %v3449_v34 = vmov %v3446_v63  ;;  %v3450_v20 = vrot.slane %v2859_v32, 7  ;;  %v2271_v32 = vld [vmem:[%s3388_s3 + $0x40] sm:$0xff]   ;;  %v2284_v45 = vld [vmem:[%s3388_s3 + $0x30] sm:$0xff]   ;;  %v2285_v26 = vld [vmem:[%s3388_s3 + $0x78] sm:$0xff]  }
 0x14f   : > { %v704_v0 = vsel %vm675_vm5, %v3449_v34, %v3448_v62  ;;  %v3000_v28 = vsel %vm653_vm4, 0.0, %v700_v22  ;;  %v3451_v61 = vmov %v3448_v62  ;;  %v2258_v37 = vpack.i.bf16 %v2715_v21, %v2693_v44  ;;  %2071 = vmatprep.subr.bf16.mxu1 %v2271_v32  ;;  %1911 = vmatprep.subr.bf16.mxu0 %v2271_v32  ;;  %v2286_v25 = vld [vmem:[%s3388_s3 + $0x38] sm:$0xff]  }
 0x150   : > { %v3007_v38 = vsel %vm675_vm5, %v3451_v61, %v3450_v20  ;;  %v3011_v39 = vsel %vm653_vm4, 0.0, %v704_v0  ;;  %v3452_v56 = vmov %v3450_v20  ;;  %v3019_v24 = vsel %vm675_vm5, %v707_v16, %v709_v17 }
 0x151   : > { %v708_v50 = vsel %vm675_vm5, %v3452_v56, %v707_v16  ;;  %v712_v55 = vsel %vm675_vm5, %v709_v17, %v711_v42  ;;  %v3023_v15 = vsel %vm675_vm5, %v711_v42, %v713_v1  ;;  %2229 = vrot.lane.b32.xlu1 %v2228_v31, %s2390_s12  ;;  %2244 = vrot.lane.b32.xlu0 %v2243_v30, %s2389_s21  ;;  %v2272_v42 = vld [vmem:[%s3388_s3] sm:$0xff]   ;;  %v2274_v16 = vld [vmem:[%s3388_s3 + $0x8] sm:$0xff]   ;;  %vm1008_vm5 = vcmask 523264  }
 0x152   : > { %v3027_v14 = vsel %vm653_vm4, 0.0, %v708_v50  ;;  %v3031_v33 = vsel %vm653_vm4, 0.0, %v712_v55  ;;  %2079 = vmatpush3.bf16.msra.mxu1 %v2272_v42  ;;  %1912 = vmatpush3.bf16.msra.mxu0 %v2272_v42  ;;  %v2275_v1 = vld [vmem:[%s3388_s3 + $0x50] sm:$0xff]   ;;  %v2277_v17 = vld [vmem:[%s3388_s3 + $0x58] sm:$0xff]   ;;  %vm987_vm4 = vcmask 261120   ;;  %vm1080_vm6 = vcmask 785408  }
 0x153   : > { %2072 = vmatprep.subr.bf16.mxu1 %v2273_v41  ;;  %1913 = vmatprep.subr.bf16.mxu0 %v2273_v41  ;;  %v2276_v30 = vld [vmem:[%s3388_s3 + $0x10] sm:$0xff]   ;;  %v2278_v31 = vld [vmem:[%s3388_s3 + $0x18] sm:$0xff]  }
 0x155   : > { %2239 = vrot.lane.b32.xlu1 %v2238_v47, %s2390_s12  ;;  %v2280_v47 = vld [vmem:[%s3388_s3 + $0x20] sm:$0xff]  }
 0x156   : > { %2080 = vmatpush3.bf16.msra.mxu1 %v2274_v16  ;;  %1914 = vmatpush3.bf16.msra.mxu0 %v2274_v16 }
 0x157   : > { %2073 = vmatprep.subr.bf16.mxu1 %v2275_v1  ;;  %1915 = vmatprep.subr.bf16.mxu0 %v2275_v1 }
 0x159   : > { %2249 = vrot.lane.b32.xlu1 %v2248_v29, %s2390_s12  ;;  %v2279_v29 = vld [vmem:[%s3388_s3 + $0x60] sm:$0xff]  }
 0x15a   : > { %2081 = vmatpush3.bf16.msra.mxu1 %v2276_v30  ;;  %1916 = vmatpush3.bf16.msra.mxu0 %v2276_v30 }
 0x15b   : > { %2074 = vmatprep.subr.bf16.mxu1 %v2277_v17  ;;  %1917 = vmatprep.subr.bf16.mxu0 %v2277_v17 }
 0x15e   : > { %2082 = vmatpush3.bf16.msra.mxu1 %v2278_v31  ;;  %1918 = vmatpush3.bf16.msra.mxu0 %v2278_v31 }
 0x15f   : > { %2075 = vmatprep.subr.bf16.mxu1 %v2279_v29  ;;  %1919 = vmatprep.subr.bf16.mxu0 %v2279_v29 }
 0x162   : > { %2083 = vmatpush3.bf16.msra.mxu1 %v2280_v47  ;;  %1920 = vmatpush3.bf16.msra.mxu0 %v2280_v47 }
 0x163   : > { %2076 = vmatprep.subr.bf16.mxu1 %v2281_v52  ;;  %1921 = vmatprep.subr.bf16.mxu0 %v2281_v52 }
 0x166   : > { %2084 = vmatpush3.bf16.msra.mxu1 %v2282_v54  ;;  %1922 = vmatpush3.bf16.msra.mxu0 %v2282_v54 }
 0x167   : > { %2077 = vmatprep.subr.bf16.mxu1 %v2283_v46  ;;  %1923 = vmatprep.subr.bf16.mxu0 %v2283_v46 }
 0x16a   : > { %2085 = vmatpush3.bf16.msra.mxu1 %v2284_v45  ;;  %1924 = vmatpush3.bf16.msra.mxu0 %v2284_v45 }
 0x16b   : > { %2078 = vmatprep.subr.bf16.mxu1 %v2285_v26  ;;  %1925 = vmatprep.subr.bf16.mxu0 %v2285_v26 }
 0x16e   : > { %2086 = vmatpush3.bf16.msra.mxu1 %v2286_v25  ;;  %1926 = vmatpush3.bf16.msra.mxu0 %v2286_v25 }
 0x1a2   : > { %v2165_v43 = vpop.permute.xlu0 %2164 }
 0x1a3   : > { %v2167_v22 = vunpack.i.h.bf16 %v2165_v43  ;;  %v2166_v63 = vunpack.i.l.bf16 %v2165_v43 }
 0x1a5   : > { %v992_v20 = vsel %vm987_vm4, %v2819_v36, %v2166_v63  ;;  %v993_v61 = vsel %vm987_vm4, %v2789_v19, %v2167_v22 }
 0x1a6   : > { %v2170_v60 = vpop.permute.xlu0 %2169  ;;  %v2175_v62 = vpop.permute.xlu1 %2174 }
 0x1a7   : > { %v2177_v34 = vunpack.i.h.bf16 %v2175_v62  ;;  %v2176_v0 = vunpack.i.l.bf16 %v2175_v62  ;;  %v2172_v42 = vunpack.i.h.bf16 %v2170_v60  ;;  %v2171_v41 = vunpack.i.l.bf16 %v2170_v60 }
 0x1a9   : > { %v1013_v56 = vsel %vm1008_vm5, %v992_v20, %v2176_v0  ;;  %v1014_v50 = vsel %vm1008_vm5, %v993_v61, %v2177_v34  ;;  %v995_v19 = vsel %vm987_vm4, %v2912_v11, %v2172_v42  ;;  %v994_v17 = vsel %vm987_vm4, %v2920_v23, %v2171_v41 }
 0x1aa   : > { %v2185_v55 = vpop.permute.xlu0 %2184  ;;  %v3091_v32 = vpack.c.bf16 %v1014_v50, %v1013_v56 }
 0x1ab   : > { %v2187_v31 = vunpack.i.h.bf16 %v2185_v55  ;;  %v2186_v29 = vunpack.i.l.bf16 %v2185_v55  ;;  %v3453_v55 = vpack.i.bf16 %v2650_v27, %v2633_v18 }
 0x1ac   : > { %1049 = vrot.lane.b32.xlu0 %v3091_v32, %s2391_s16  ;;  %v2180_v16 = vpop.permute.xlu1 %2179 }
 0x1ad   : > { %v2182_v1 = vunpack.i.h.bf16 %v2180_v16  ;;  %v2181_v30 = vunpack.i.l.bf16 %v2180_v16  ;;  %v997_v43 = vsel %vm987_vm4, %v2957_v48, %v2187_v31  ;;  %v996_v11 = vsel %vm987_vm4, %v2961_v59, %v2186_v29 }
 0x1ae   : > { %v2195_v36 = vpop.permute.xlu0 %2194 }
 0x1af   : > { %v1015_v47 = vsel %vm1008_vm5, %v994_v17, %v2181_v30  ;;  %v1016_v52 = vsel %vm1008_vm5, %v995_v19, %v2182_v1  ;;  %v2197_v22 = vunpack.i.h.bf16 %v2195_v36  ;;  %v2196_v23 = vunpack.i.l.bf16 %v2195_v36 }
 0x1b0   : > { %v2190_v54 = vpop.permute.xlu1 %2189  ;;  %v3101_v46 = vpack.c.bf16 %v1016_v52, %v1015_v47 }
 0x1b1   : > { %v2192_v45 = vunpack.i.h.bf16 %v2190_v54  ;;  %v2191_v26 = vunpack.i.l.bf16 %v2190_v54  ;;  %v999_v59 = vsel %vm987_vm4, %v2973_v49, %v2197_v22  ;;  %v998_v61 = vsel %vm987_vm4, %v2978_v57, %v2196_v23  ;;  %v3130_v49 = vld [vmem:[%s3388_s3 + $0x80] sm:$0xff]  }
 0x1b2   : > { %1066 = vrot.lane.b32.xlu1 %v3101_v46, %s2390_s12  ;;  %1051 = vrot.lane.b32.xlu0 %v3101_v46, %s2391_s16 }
 0x1b3   : > { %v2200_v25 = vpop.permute.xlu0 %2199  ;;  %v1017_v63 = vsel %vm1008_vm5, %v996_v11, %v2191_v26  ;;  %v1018_v60 = vsel %vm1008_vm5, %v997_v43, %v2192_v45  ;;  %2031 = vmatprep.subr.bf16.mxu0 %v3130_v49 }
 0x1b4   : > { %v2205_v62 = vpop.permute.xlu1 %2204  ;;  %v3113_v34 = vpack.c.bf16 %v1018_v60, %v1017_v63  ;;  %v2202_v56 = vunpack.i.h.bf16 %v2200_v25  ;;  %v2201_v50 = vunpack.i.l.bf16 %v2200_v25 }
 0x1b5   : > { %v2207_v0 = vunpack.i.h.bf16 %v2205_v62  ;;  %v2206_v48 = vunpack.i.l.bf16 %v2205_v62 }
 0x1b6   : > { %1068 = vrot.lane.b32.xlu1 %v3113_v34, %s2390_s12  ;;  %2254 = vrot.lane.b32.xlu0 %v3453_v55, %s2389_s21  ;;  %v991_v18 = vsel %vm987_vm4, %v2675_v40, %v2202_v56  ;;  %v990_v27 = vsel %vm987_vm4, %v2690_v53, %v2201_v50  ;;  %s1892_s21 = sshll.u32 %s2371_s27, 4  ;;  %s1747_s27 = sshll.u32 %s2547_s11, 4  ;;  %s3321_s27 = int_to_ptr.vmem [resolvable:$true] %s1747_s27 }
 0x1b7   : > { %v2215_v20 = vpop.permute.xlu0 %2214  ;;  %v1019_v42 = vsel %vm1008_vm5, %v998_v61, %v2206_v48  ;;  %v1020_v41 = vsel %vm1008_vm5, %v999_v59, %v2207_v0  ;;  %p2298_p1 = scmp.lt.s32.totalorder %s3321_s27, %s2296_s18 }
 0x1b8   : > { %v3132_v16 = vpack.c.bf16 %v1020_v41, %v1019_v42  ;;  %v2217_v19 = vunpack.i.h.bf16 %v2215_v20  ;;  %v2216_v17 = vunpack.i.l.bf16 %v2215_v20 }
 0x1ba   : > { %1070 = vrot.lane.b32.xlu0 %v3132_v16, %s2390_s12  ;;  %2259 = vrot.lane.b32.xlu1 %v2258_v37, %s2390_s12  ;;  %v1001_v53 = vsel %vm987_vm4, %v2990_v51, %v2217_v19  ;;  %v1000_v26 = vsel %vm987_vm4, %v3000_v28, %v2216_v17 }
 0x1bb   : > { %v2210_v57 = vpop.permute.xlu1 %2209  ;;  %v2225_v36 = vpop.permute.xlu0 %2224 }
 0x1bc   : > { %v2212_v1 = vunpack.i.h.bf16 %v2210_v57  ;;  %v2211_v30 = vunpack.i.l.bf16 %v2210_v57  ;;  %v2227_v25 = vunpack.i.h.bf16 %v2225_v36  ;;  %v2226_v43 = vunpack.i.l.bf16 %v2225_v36 }
 0x1be   : > { %v1011_v31 = vsel %vm1008_vm5, %v990_v27, %v2211_v30  ;;  %v1012_v29 = vsel %vm1008_vm5, %v991_v18, %v2212_v1  ;;  %1053 = vrot.lane.b32.xlu1 %v3113_v34, %s2391_s16  ;;  %v1003_v51 = vsel %vm987_vm4, %v3007_v38, %v2227_v25  ;;  %v1002_v28 = vsel %vm987_vm4, %v3011_v39, %v2226_v43 }
 0x1bf   : > { %v2220_v47 = vpop.permute.xlu1 %2219  ;;  %v1030_v52 = vpack.c.bf16 %v1012_v29, %v1011_v31  ;;  %v2235_v45 = vpop.permute.xlu0 %2234 }
 0x1c0   : > { %v2222_v40 = vunpack.i.h.bf16 %v2220_v47  ;;  %v2221_v54 = vunpack.i.l.bf16 %v2220_v47  ;;  %v2237_v63 = vunpack.i.h.bf16 %v2235_v45  ;;  %v2236_v60 = vunpack.i.l.bf16 %v2235_v45 }
 0x1c1   : > { %1047 = vrot.lane.b32.xlu0 %v1030_v52, %s2391_s16 }
 0x1c2   : > { %v1021_v44 = vsel %vm1008_vm5, %v1000_v26, %v2221_v54  ;;  %v1022_v21 = vsel %vm1008_vm5, %v1001_v53, %v2222_v40  ;;  %1064 = vrot.lane.b32.xlu1 %v3091_v32, %s2390_s12  ;;  %v1005_v39 = vsel %vm987_vm4, %v3019_v24, %v2237_v63  ;;  %v1004_v56 = vsel %vm987_vm4, %v3027_v14, %v2236_v60 }
 0x1c3   : > { %v2230_v37 = vpop.permute.xlu1 %2229  ;;  %v3156_v11 = vpack.c.bf16 %v1022_v21, %v1021_v44  ;;  %v2245_v62 = vpop.permute.xlu0 %2244 }
 0x1c4   : > { %v2232_v22 = vunpack.i.h.bf16 %v2230_v37  ;;  %v2231_v23 = vunpack.i.l.bf16 %v2230_v37  ;;  %v2247_v50 = vunpack.i.h.bf16 %v2245_v62  ;;  %v2246_v55 = vunpack.i.l.bf16 %v2245_v62 }
 0x1c5   : > { %1055 = vrot.lane.b32.xlu0 %v3132_v16, %s2391_s16 }
 0x1c6   : > { %v1023_v0 = vsel %vm1008_vm5, %v1002_v28, %v2231_v23  ;;  %v1024_v48 = vsel %vm1008_vm5, %v1003_v51, %v2232_v22  ;;  %1072 = vrot.lane.b32.xlu1 %v3156_v11, %s2390_s12  ;;  %v1007_v24 = vsel %vm987_vm4, %v3023_v15, %v2247_v50  ;;  %v1006_v14 = vsel %vm987_vm4, %v3031_v33, %v2246_v55  ;;  %v2289_v15 = vld [vmem:[%s3390_s5] sm:$0xff]  }
 0x1c7   : > { %v2240_v20 = vpop.permute.xlu1 %2239  ;;  %v3168_v59 = vpack.c.bf16 %v1024_v48, %v1023_v0  ;;  %2051 = vmatprep.subr.bf16.mxu1 %v2289_v15 }
 0x1c8   : > { %v2242_v38 = vunpack.i.h.bf16 %v2240_v20  ;;  %v2241_v61 = vunpack.i.l.bf16 %v2240_v20 }
 0x1c9   : > { %1057 = vrot.lane.b32.xlu0 %v3156_v11, %s2391_s16 }
 0x1ca   : > { %v1025_v42 = vsel %vm1008_vm5, %v1004_v56, %v2241_v61  ;;  %v1026_v41 = vsel %vm1008_vm5, %v1005_v39, %v2242_v38  ;;  %1074 = vrot.lane.b32.xlu1 %v3168_v59, %s2390_s12 }
 0x1cb   : > { %v2250_v57 = vpop.permute.xlu1 %2249  ;;  %v1037_v1 = vpack.c.bf16 %v1026_v41, %v1025_v42 }
 0x1cc   : > { %v2252_v30 = vunpack.i.h.bf16 %v2250_v57  ;;  %v2251_v36 = vunpack.i.l.bf16 %v2250_v57 }
 0x1cd   : > { %1059 = vrot.lane.b32.xlu0 %v3168_v59, %s2391_s16 }
 0x1ce   : > { %v1027_v18 = vsel %vm1008_vm5, %v1006_v14, %v2251_v36  ;;  %v1028_v27 = vsel %vm1008_vm5, %v1007_v24, %v2252_v30  ;;  %1076 = vrot.lane.b32.xlu1 %v1037_v1, %s2390_s12  ;;  %v2290_v36 = vld [vmem:[%s3390_s5 + $0x8] sm:$0xff]  }
 0x1cf   : > { %v1038_v19 = vpack.c.bf16 %v1028_v27, %v1027_v18 }
 0x1d1   : > { %1061 = vrot.lane.b32.xlu0 %v1037_v1, %s2391_s16  ;;  %s2291_s16 = scalar_lea.vmem %s3321_s27, 2048 }
 0x1d2   : > { %1078 = vrot.lane.b32.xlu1 %v1038_v19, %s2390_s12  ;;  %s1744_s12 = sadd.s32 %s1892_s21, %s1886_s23  ;;  %p2292_p12 = scmp.ne.s32.totalorder %s3321_s27, %s2291_s16 }
 0x1d3   : > { %s1887_s28 = sshll.u32 %s1744_s12, 7  ;;  %s2297_s21 = scalar_lea.vmem %s2296_s18, 4096 }
 0x1d4   : > { %s3327_s10 = scalar_lea.hbm %s3392_s7, %s1887_s28  ;;  %p2293_p13 = pnand %p2292_p12, %p2486_p3 }
 0x1d5   : > { %p2299_p2 = scmp.lt.s32.totalorder %s2297_s21, %s2291_s16 }
 0x1d6   : > { %p2294_p0 = pneg %p2293_p13 }
 0x1d7   : > { %p2300_p4 = por %p2299_p2, %p2298_p1 }
 0x1d9   : > { %p2301_p5 = pnand %p2300_p4, %p2294_p0 }
 0x21e   : > { %v1050_v33 = vpop.permute.xlu0 %1049 }
 0x21f   : > { %v1087_v47 = vsel %vm1080_vm6, %v1030_v52, %v1050_v33 }
 0x224   : > { %v1067_v17 = vpop.permute.xlu1 %1066  ;;  %v1052_v31 = vpop.permute.xlu0 %1051 }
 0x225   : > { %v1117_v29 = vsel %vm1008_vm5, %v1050_v33, %v1067_v17  ;;  %v1091_v52 = vsel %vm1080_vm6, %v3091_v32, %v1052_v31 }
 0x226   : > { %1344 = vmatprep.mubr.bf16.mxu1 %v1117_v29 }
 0x227   : > { %1345 = vmatmul.mubr.bf16.vlgmr.msra.gmra.mrb[0].mxu1 %v1087_v47 }
 0x228   : > { %v1069_v40 = vpop.permute.xlu1 %1068  ;;  %v2255_v54 = vpop.permute.xlu0 %2254  ;;  %2052 = vmatpush3.bf16.msra.mxu1 %v2289_v15 }
 0x229   : > { %v1120_v45 = vsel %vm1008_vm5, %v1052_v31, %v1069_v40  ;;  %v2257_v53 = vunpack.i.h.bf16 %v2255_v54  ;;  %v2256_v26 = vunpack.i.l.bf16 %v2255_v54  ;;  %2053 = vmatprep.subr.bf16.mxu1 %v2290_v36 }
 0x22a   : > { %1352 = vmatprep.mubr.bf16.mxu1 %v1120_v45 }
 0x22b   : > { %v988_v37 = vsel %vm987_vm4, %v2662_v35, %v2256_v26  ;;  %v989_v22 = vsel %vm987_vm4, %v2701_v58, %v2257_v53  ;;  %v2288_v58 = vld [vmem:[%s3388_s3 + $0x88] sm:$0xff]  }
 0x22c   : > { %v1071_v25 = vpop.permute.xlu0 %1070  ;;  %v2260_v43 = vpop.permute.xlu1 %2259  ;;  %2054 = vmatpush3.bf16.msra.mxu1 %v2290_v36 }
 0x22d   : > { %v2262_v44 = vunpack.i.h.bf16 %v2260_v43  ;;  %v2261_v21 = vunpack.i.l.bf16 %v2260_v43 }
 0x22f   : > { %v1009_v23 = vsel %vm1008_vm5, %v988_v37, %v2261_v21  ;;  %v1010_v51 = vsel %vm1008_vm5, %v989_v22, %v2262_v44  ;;  %1353 = vmatmul.mubr.bf16.gmra.mrb[4].mxu1 %v1091_v52  ;;  %v3242_v52 = vld [vmem:[%s3389_s4] ss:$0 sm:$0xff] }
 0x230   : > { %v1029_v28 = vpack.c.bf16 %v1010_v51, %v1009_v23  ;;  %v1054_v63 = vpop.permute.xlu1 %1053 }
 0x231   : > { %v1123_v60 = vsel %vm1008_vm5, %v1054_v63, %v1071_v25  ;;  %v1095_v48 = vsel %vm1080_vm6, %v3101_v46, %v1054_v63 }
 0x232   : > { %1360 = vmatprep.mubr.bf16.mxu1 %v1123_v60 }
 0x233   : > { %v1048_v62 = vpop.permute.xlu0 %1047 }
 0x234   : > { %v1065_v0 = vpop.permute.xlu1 %1064  ;;  %v1083_v32 = vsel %vm1080_vm6, %v1029_v28, %v1048_v62 }
 0x235   : > { %v1114_v35 = vsel %vm1008_vm5, %v1048_v62, %v1065_v0 }
 0x236   : > { %1336 = vmatprep.mubr.bf16.mxu0 %v1114_v35 }
 0x237   : > { %1337 = vmatmul.mubr.bf16.vlgmr.msra.gmra.mrb[20].mxu0 %v1083_v32  ;;  %1361 = vmatmul.mubr.bf16.gmra.mrb[8].mxu1 %v1095_v48  ;;  %v1056_v20 = vpop.permute.xlu0 %1055 }
 0x238   : > { %v1073_v38 = vpop.permute.xlu1 %1072  ;;  %2032 = vmatpush3.bf16.msra.mxu0 %v3130_v49  ;;  %2035 = vmatprep.mubr.msk.bf16.mxu0 %vm987_vm4, %v1065_v0  ;;  %v1099_v50 = vsel %vm1080_vm6, %v3113_v34, %v1056_v20 }
 0x239   : > { %v1126_v61 = vsel %vm1008_vm5, %v1056_v20, %v1073_v38  ;;  %2033 = vmatprep.subr.bf16.mxu0 %v2288_v58 }
 0x23a   : > { %1368 = vmatprep.mubr.bf16.mxu1 %v1126_v61 }
 0x23b   : > { %v1058_v56 = vpop.permute.xlu0 %1057 }
 0x23c   : > { %v1075_v39 = vpop.permute.xlu1 %1074  ;;  %2034 = vmatpush3.bf16.msra.mxu0 %v2288_v58  ;;  %v1103_v42 = vsel %vm1080_vm6, %v3132_v16, %v1058_v56 }
 0x23d   : > { %v1129_v46 = vsel %vm1008_vm5, %v1058_v56, %v1075_v39 }
 0x23f   : > { %1369 = vmatmul.mubr.bf16.gmra.mrb[12].mxu1 %v1099_v50  ;;  %2036 = vmatmul.mubr.msk.bf16.vlgmr.msra.gmra.mrb[24].mxu0 %vm987_vm4, %v1067_v17  ;;  %v1060_v55 = vpop.permute.xlu0 %1059 }
 0x240   : > { %1376 = vmatprep.mubr.bf16.mxu1 %v1129_v46  ;;  %2039 = vmatprep.mubr.msk.bf16.mxu0 %vm987_vm4, %v1069_v40  ;;  %v1077_v49 = vpop.permute.xlu1 %1076  ;;  %v1107_v1 = vsel %vm1080_vm6, %v3156_v11, %v1060_v55 }
 0x241   : > { %v1132_v41 = vsel %vm1008_vm5, %v1060_v55, %v1077_v49 }
 0x243   : > { %v1062_v57 = vpop.permute.xlu0 %1061 }
 0x244   : > { %v1079_v34 = vpop.permute.xlu1 %1078  ;;  %v1111_v16 = vsel %vm1080_vm6, %v3168_v59, %v1062_v57 }
 0x245   : > { %v1135_v30 = vsel %vm1008_vm5, %v1062_v57, %v1079_v34 }
 0x247   : > { %1377 = vmatmul.mubr.bf16.gmra.mrb[16].mxu1 %v1103_v42  ;;  %2040 = vmatmul.mubr.msk.bf16.gmra.mrb[28].mxu0 %vm987_vm4, %v1071_v25 }
 0x248   : > { %1384 = vmatprep.mubr.bf16.mxu1 %v1132_v41  ;;  %2043 = vmatprep.mubr.msk.bf16.mxu0 %vm987_vm4, %v1073_v38 }
 0x24f   : > { %1385 = vmatmul.mubr.bf16.gmra.mrb[20].mxu1 %v1107_v1  ;;  %2044 = vmatmul.mubr.msk.bf16.gmra.mrb[32].mxu0 %vm987_vm4, %v1075_v39 }
 0x250   : > { %1392 = vmatprep.mubr.bf16.mxu1 %v1135_v30  ;;  %2047 = vmatprep.mubr.msk.bf16.mxu0 %vm987_vm4, %v1077_v49 }
 0x257   : > { %1393 = vmatmul.mubr.bf16.gmra.mrb[24].mxu1 %v1111_v16  ;;  %2048 = vmatmul.mubr.msk.bf16.gmra.mrb[36].mxu0 %vm987_vm4, %v1079_v34 }
 0x2fa   : > { %v1933_v11 = vpop.f32.mrb[0].mxu1 }
 0x2fb   : > { %v1934_v24 = vpop.f32.mrb[1].mxu1 }
 0x2fc   : > { %v1935_v14 = vadd.f32 %v1934_v24, %v1933_v11  ;;  %v1936_v18 = vpop.f32.mrb[2].mxu1 }
 0x2fd   : > { %v1937_v27 = vpop.f32.mrb[3].mxu1 }
 0x2fe   : > { %v1938_v19 = vadd.f32 %v1937_v27, %v1936_v18  ;;  %v1347_v23 = vadd.f32 %v1935_v14, %v3242_v52 }
 0x300   : > { %v1350_v35 = vadd.f32 %v1938_v19, %v3242_v52 }
 0x302   : > { %v1939_v15 = vpop.f32.mrb[4].mxu1 }
 0x303   : > { %v1940_v33 = vpop.f32.mrb[5].mxu1 }
 0x304   : > { %v1941_v17 = vadd.f32 %v1940_v33, %v1939_v15  ;;  %v1942_v31 = vpop.f32.mrb[6].mxu1 }
 0x305   : > { %v1943_v59 = vpop.f32.mrb[7].mxu1 }
 0x306   : > { %v1944_v29 = vadd.f32 %v1943_v59, %v1942_v31  ;;  %v1355_v36 = vadd.f32 %v1941_v17, %v3242_v52 }
 0x308   : > { %v1358_v31 = vadd.f32 %v1944_v29, %v3242_v52 }
 0x30a   : > { %v1927_v47 = vpop.f32.mrb[20].mxu0  ;;  %v1945_v40 = vpop.f32.mrb[8].mxu1 }
 0x30b   : > { %v1928_v54 = vpop.f32.mrb[21].mxu0  ;;  %v1946_v45 = vpop.f32.mrb[9].mxu1 }
 0x30c   : > { %v1929_v53 = vadd.f32 %v1928_v54, %v1927_v47  ;;  %v1947_v26 = vadd.f32 %v1946_v45, %v1945_v40  ;;  %v1930_v25 = vpop.f32.mrb[22].mxu0  ;;  %v1948_v43 = vpop.f32.mrb[10].mxu1 }
 0x30d   : > { %v1931_v44 = vpop.f32.mrb[23].mxu0  ;;  %v1949_v21 = vpop.f32.mrb[11].mxu1 }
 0x30e   : > { %v1932_v37 = vadd.f32 %v1931_v44, %v1930_v25  ;;  %v1950_v22 = vadd.f32 %v1949_v21, %v1948_v43  ;;  %v1339_v63 = vadd.f32 %v1929_v53, %v3242_v52  ;;  %v1363_v57 = vadd.f32 %v1947_v26, %v3242_v52 }
 0x310   : > { %v1342_v38 = vadd.f32 %v1932_v37, %v3242_v52  ;;  %v1366_v18 = vadd.f32 %v1950_v22, %v3242_v52 }
 0x312   : > { %v1951_v51 = vpop.f32.mrb[12].mxu1  ;;  %v2037_v28 = vpop.f32.mrb[24].mxu0 }
 0x313   : > { %v1444_v60 = vadd.f32 %v2037_v28, %v1347_v23  ;;  %v1952_v62 = vpop.f32.mrb[13].mxu1  ;;  %v1435_v0 = vpop.f32.mrb[25].mxu0 }
 0x314   : > { %v1953_v58 = vadd.f32 %v1952_v62, %v1951_v51  ;;  %v1436_v32 = vadd.f32 %v1435_v0, %v1339_v63  ;;  %v1954_v48 = vpop.f32.mrb[14].mxu1  ;;  %v2038_v20 = vpop.f32.mrb[26].mxu0 }
 0x315   : > { %v1447_v61 = vadd.f32 %v2038_v20, %v1350_v35  ;;  %v1955_v39 = vpop.f32.mrb[15].mxu1  ;;  %v1438_v56 = vpop.f32.mrb[27].mxu0  ;;  %v1500_v49 = vmax.f32 %v1444_v60, 0.0 }
 0x316   : > { %v1956_v50 = vadd.f32 %v1955_v39, %v1954_v48  ;;  %v1439_v46 = vadd.f32 %v1438_v56, %v1342_v38  ;;  %v1498_v42 = vmax.f32 %v1436_v32, 0.0  ;;  %v1371_v23 = vadd.f32 %v1953_v58, %v3242_v52 }
 0x317   : > { %v1501_v55 = vmax.f32 %v1447_v61, 0.0 }
 0x318   : > { %v1499_v41 = vmax.f32 %v1439_v46, 0.0  ;;  %v1374_v32 = vadd.f32 %v1956_v50, %v3242_v52 }
 0x319   : > { %v1515_v34 = vpack.c.bf16 %v1501_v55, %v1500_v49 }
 0x31a   : > { %v1514_v1 = vpack.c.bf16 %v1499_v41, %v1498_v42  ;;  %v1957_v30 = vpop.f32.mrb[16].mxu1  ;;  %v2041_v16 = vpop.f32.mrb[28].mxu0 }
 0x31b   : > { %v1460_v11 = vadd.f32 %v2041_v16, %v1363_v57  ;;  %v1958_v24 = vpop.f32.mrb[17].mxu1  ;;  %v1451_v14 = vpop.f32.mrb[29].mxu0 }
 0x31c   : > { %v1959_v27 = vadd.f32 %v1958_v24, %v1957_v30  ;;  %v1452_v19 = vadd.f32 %v1451_v14, %v1355_v36  ;;  %v1960_v15 = vpop.f32.mrb[18].mxu1  ;;  %v2042_v33 = vpop.f32.mrb[30].mxu0  ;;  %2055 = vmatprep.mubr.msk.bf16.mxu1 %vm987_vm4, %v1514_v1 }
 0x31d   : > { %v1463_v59 = vadd.f32 %v2042_v33, %v1366_v18  ;;  %v1961_v47 = vpop.f32.mrb[19].mxu1  ;;  %v1454_v40 = vpop.f32.mrb[31].mxu0  ;;  %2056 = vmatmul.mubr.msk.bf16.vlgmr.msra.gmra.mrb[28].mxu1 %vm987_vm4, %v1515_v34  ;;  %v1504_v45 = vmax.f32 %v1460_v11, 0.0 }
 0x31e   : > { %v1962_v54 = vadd.f32 %v1961_v47, %v1960_v15  ;;  %v1455_v17 = vadd.f32 %v1454_v40, %v1358_v31  ;;  %v1502_v26 = vmax.f32 %v1452_v19, 0.0  ;;  %v1379_v44 = vadd.f32 %v1959_v27, %v3242_v52 }
 0x31f   : > { %v1505_v53 = vmax.f32 %v1463_v59, 0.0 }
 0x320   : > { %v1503_v25 = vmax.f32 %v1455_v17, 0.0  ;;  %v1382_v63 = vadd.f32 %v1962_v54, %v3242_v52 }
 0x321   : > { %v1517_v43 = vpack.c.bf16 %v1505_v53, %v1504_v45 }
 0x322   : > { %v1516_v21 = vpack.c.bf16 %v1503_v25, %v1502_v26  ;;  %v1963_v37 = vpop.f32.mrb[20].mxu1  ;;  %v2045_v22 = vpop.f32.mrb[32].mxu0  ;;  %v3271_v26 = vld [vmem:[%s3391_s6] ss:$0 sm:$0xff] }
 0x323   : > { %v1476_v29 = vadd.f32 %v2045_v22, %v1379_v44  ;;  %v1964_v51 = vpop.f32.mrb[21].mxu1  ;;  %v1467_v28 = vpop.f32.mrb[33].mxu0 }
 0x324   : > { %v1965_v60 = vadd.f32 %v1964_v51, %v1963_v37  ;;  %v1468_v62 = vadd.f32 %v1467_v28, %v1371_v23  ;;  %v1966_v0 = vpop.f32.mrb[22].mxu1  ;;  %v2046_v35 = vpop.f32.mrb[34].mxu0  ;;  %2059 = vmatprep.mubr.msk.bf16.mxu1 %vm987_vm4, %v1516_v21 }
 0x325   : > { %v1479_v48 = vadd.f32 %v2046_v35, %v1382_v63  ;;  %v1967_v20 = vpop.f32.mrb[23].mxu1  ;;  %v1470_v38 = vpop.f32.mrb[35].mxu0  ;;  %2060 = vmatmul.mubr.msk.bf16.gmra.mrb[32].mxu1 %vm987_vm4, %v1517_v43  ;;  %v1508_v39 = vmax.f32 %v1476_v29, 0.0 }
 0x326   : > { %v1968_v61 = vadd.f32 %v1967_v20, %v1966_v0  ;;  %v1471_v58 = vadd.f32 %v1470_v38, %v1374_v32  ;;  %v1506_v46 = vmax.f32 %v1468_v62, 0.0  ;;  %v1387_v57 = vadd.f32 %v1965_v60, %v3242_v52 }
 0x327   : > { %v1509_v56 = vmax.f32 %v1479_v48, 0.0 }
 0x328   : > { %v1507_v49 = vmax.f32 %v1471_v58, 0.0  ;;  %v1390_v24 = vadd.f32 %v1968_v61, %v3242_v52 }
 0x329   : > { %v1519_v55 = vpack.c.bf16 %v1509_v56, %v1508_v39 }
 0x32a   : > { %v1518_v42 = vpack.c.bf16 %v1507_v49, %v1506_v46  ;;  %v1969_v41 = vpop.f32.mrb[24].mxu1  ;;  %v2049_v34 = vpop.f32.mrb[36].mxu0 }
 0x32b   : > { %v1970_v1 = vpop.f32.mrb[25].mxu1  ;;  %v1483_v30 = vpop.f32.mrb[37].mxu0 }
 0x32c   : > { %v1971_v50 = vadd.f32 %v1970_v1, %v1969_v41  ;;  %v1484_v16 = vadd.f32 %v1483_v30, %v1387_v57  ;;  %v1972_v36 = vpop.f32.mrb[26].mxu1  ;;  %v2050_v11 = vpop.f32.mrb[38].mxu0  ;;  %2063 = vmatprep.mubr.msk.bf16.mxu1 %vm987_vm4, %v1518_v42 }
 0x32d   : > { %v1973_v14 = vpop.f32.mrb[27].mxu1  ;;  %v1486_v18 = vpop.f32.mrb[39].mxu0  ;;  %2064 = vmatmul.mubr.msk.bf16.gmra.mrb[36].mxu1 %vm987_vm4, %v1519_v55 }
 0x32e   : > { %v1395_v27 = vadd.f32 %v1971_v50, %v3242_v52  ;;  %v1974_v19 = vadd.f32 %v1973_v14, %v1972_v36  ;;  %v1487_v15 = vadd.f32 %v1486_v18, %v1390_v24  ;;  %v1510_v31 = vmax.f32 %v1484_v16, 0.0 }
 0x330   : > { %v1492_v33 = vadd.f32 %v2049_v34, %v1395_v27  ;;  %v1398_v59 = vadd.f32 %v1974_v19, %v3242_v52  ;;  %v1511_v47 = vmax.f32 %v1487_v15, 0.0 }
 0x332   : > { %v1495_v40 = vadd.f32 %v2050_v11, %v1398_v59  ;;  %v1520_v54 = vpack.c.bf16 %v1511_v47, %v1510_v31  ;;  %v1512_v17 = vmax.f32 %v1492_v33, 0.0 }
 0x334   : > { %v1513_v45 = vmax.f32 %v1495_v40, 0.0  ;;  %2067 = vmatprep.mubr.msk.bf16.mxu1 %vm987_vm4, %v1520_v54 }
 0x336   : > { %v1521_v53 = vpack.c.bf16 %v1513_v45, %v1512_v17  ;;  %v3454_v17 = vld [vmem:[#allocation11_spill] sm:$0xff] }
 0x338   : > { %2068 = vmatmul.mubr.msk.bf16.gmra.mrb[40].mxu1 %vm987_vm4, %v1521_v53 }
 0x3f0   : > { %v2057_v25 = vpop.f32.mrb[28].mxu1 }
 0x3f1   : > { %v1612_v43 = vadd.f32 %v2057_v25, %v3271_v26  ;;  %v1603_v44 = vpop.f32.mrb[29].mxu1 }
 0x3f2   : > { %v1604_v52 = vadd.f32 %v3271_v26, %v1603_v44  ;;  %v2058_v21 = vpop.f32.mrb[30].mxu1 }
 0x3f3   : > { %v1668_v37 = vmax.f32 %v1612_v43, 0.0  ;;  %v1615_v22 = vadd.f32 %v2058_v21, %v3271_v26  ;;  %v1606_v23 = vpop.f32.mrb[31].mxu1 }
 0x3f4   : > { %v1666_v29 = vmax.f32 %v1604_v52, 0.0  ;;  %v1607_v51 = vadd.f32 %v3271_v26, %v1606_v23 }
 0x3f5   : > { %v1684_v28 = vadd.f32 %v1668_v37, %v2519_v4  ;;  %v1669_v63 = vmax.f32 %v1615_v22, 0.0 }
 0x3f6   : > { %v1682_v60 = vadd.f32 %v1666_v29, %v2515_v2  ;;  %v1667_v62 = vmax.f32 %v1607_v51, 0.0  ;;  %v3455_v29 = vld [vmem:[#allocation14_spill] sm:$0xff] }
 0x3f7   : > { %v1700_v0 = vmax.f32 %v1684_v28, 0.0  ;;  %v1685_v35 = vadd.f32 %v1669_v63, %v2521_v5  ;;  %v3456_v63 = vld [vmem:[#allocation12_spill] sm:$0xff] }
 0x3f8   : > { %v1698_v32 = vmax.f32 %v1682_v60, 0.0  ;;  %v1683_v48 = vadd.f32 %v1667_v62, %v2517_v3  ;;  %v2061_v20 = vpop.f32.mrb[32].mxu1 }
 0x3f9   : > { %1716 = vst [vmem:[%s2547_s11 + $0x10] sm:$0xff] %v1700_v0  ;;  %v1701_v38 = vmax.f32 %v1685_v35, 0.0  ;;  %v1628_v61 = vadd.f32 %v2061_v20, %v3271_v26  ;;  %v1619_v58 = vpop.f32.mrb[33].mxu1  ;;  %v3457_v35 = vld [vmem:[#allocation15_spill] sm:$0xff]  ;;  %v3458_v20 = vld [vmem:[#allocation13_spill] sm:$0xff] }
 0x3fa   : > { %1714 = vst [vmem:[%s2547_s11] sm:$0xff] %v1698_v32  ;;  %v1699_v4 = vmax.f32 %v1683_v48, 0.0  ;;  %v1620_v39 = vadd.f32 %v3271_v26, %v1619_v58  ;;  %v2062_v56 = vpop.f32.mrb[34].mxu1 }
 0x3fb   : > { %1717 = vst [vmem:[%s2547_s11 + $0x18] sm:$0xff] %v1701_v38  ;;  %v1672_v2 = vmax.f32 %v1628_v61, 0.0  ;;  %v1631_v5 = vadd.f32 %v2062_v56, %v3271_v26  ;;  %v1622_v46 = vpop.f32.mrb[35].mxu1 }
 0x3fc   : > { %1715 = vst [vmem:[%s2547_s11 + $0x8] sm:$0xff] %v1699_v4  ;;  %v1670_v3 = vmax.f32 %v1620_v39, 0.0  ;;  %v1623_v49 = vadd.f32 %v3271_v26, %v1622_v46 }
 0x3fd   : > { %v1688_v55 = vadd.f32 %v1672_v2, %v2527_v8  ;;  %v1673_v42 = vmax.f32 %v1631_v5, 0.0 }
 0x3fe   : > { %v1686_v41 = vadd.f32 %v1670_v3, %v2523_v6  ;;  %v1671_v34 = vmax.f32 %v1623_v49, 0.0 }
 0x3ff   : > { %v1704_v57 = vmax.f32 %v1688_v55, 0.0  ;;  %v1689_v1 = vadd.f32 %v1673_v42, %v2529_v9 }
 0x400   : > { %v1702_v30 = vmax.f32 %v1686_v41, 0.0  ;;  %v1687_v50 = vadd.f32 %v1671_v34, %v2525_v7  ;;  %v2065_v16 = vpop.f32.mrb[36].mxu1 }
 0x401   : > { %1720 = vst [vmem:[%s2547_s11 + $0x30] sm:$0xff] %v1704_v57  ;;  %v1705_v36 = vmax.f32 %v1689_v1, 0.0  ;;  %v1644_v11 = vadd.f32 %v2065_v16, %v3271_v26  ;;  %v1635_v24 = vpop.f32.mrb[37].mxu1 }
 0x402   : > { %1718 = vst [vmem:[%s2547_s11 + $0x20] sm:$0xff] %v1702_v30  ;;  %v1703_v8 = vmax.f32 %v1687_v50, 0.0  ;;  %v1636_v14 = vadd.f32 %v3271_v26, %v1635_v24  ;;  %v2066_v18 = vpop.f32.mrb[38].mxu1 }
 0x403   : > { %1721 = vst [vmem:[%s2547_s11 + $0x38] sm:$0xff] %v1705_v36  ;;  %v1676_v6 = vmax.f32 %v1644_v11, 0.0  ;;  %v1647_v9 = vadd.f32 %v2066_v18, %v3271_v26  ;;  %v1638_v27 = vpop.f32.mrb[39].mxu1 }
 0x404   : > { %1719 = vst [vmem:[%s2547_s11 + $0x28] sm:$0xff] %v1703_v8  ;;  %v1674_v7 = vmax.f32 %v1636_v14, 0.0  ;;  %v1639_v19 = vadd.f32 %v3271_v26, %v1638_v27 }
 0x405   : > { %v1692_v15 = vadd.f32 %v1676_v6, %v2535_v12  ;;  %v1677_v33 = vmax.f32 %v1647_v9, 0.0 }
 0x406   : > { %v1690_v31 = vadd.f32 %v1674_v7, %v2531_v10  ;;  %v1675_v59 = vmax.f32 %v1639_v19, 0.0 }
 0x407   : > { %v1708_v47 = vmax.f32 %v1692_v15, 0.0  ;;  %v1693_v40 = vadd.f32 %v1677_v33, %v2537_v13 }
 0x408   : > { %v1706_v54 = vmax.f32 %v1690_v31, 0.0  ;;  %v1691_v45 = vadd.f32 %v1675_v59, %v3454_v17 }
 0x409   : > { %1724 = vst [vmem:[%s2547_s11 + $0x50] sm:$0xff] %v1708_v47  ;;  %v1709_v53 = vmax.f32 %v1693_v40, 0.0 }
 0x40a   : > { %1722 = vst [vmem:[%s2547_s11 + $0x40] sm:$0xff] %v1706_v54  ;;  %v1707_v25 = vmax.f32 %v1691_v45, 0.0 }
 0x40b   : > { %1725 = vst [vmem:[%s2547_s11 + $0x58] sm:$0xff] %v1709_v53  ;;  %v2069_v43 = vpop.f32.mrb[40].mxu1 }
 0x40c   : > { %1723 = vst [vmem:[%s2547_s11 + $0x48] sm:$0xff] %v1707_v25  ;;  %v1660_v12 = vadd.f32 %v2069_v43, %v3271_v26  ;;  %v1651_v44 = vpop.f32.mrb[41].mxu1 }
 0x40d   : > { %v1652_v10 = vadd.f32 %v3271_v26, %v1651_v44  ;;  %v2070_v52 = vpop.f32.mrb[42].mxu1 }
 0x40e   : > { %v1680_v13 = vmax.f32 %v1660_v12, 0.0  ;;  %v1663_v21 = vadd.f32 %v2070_v52, %v3271_v26  ;;  %v1654_v37 = vpop.f32.mrb[43].mxu1 }
 0x40f   : > { %v1678_v22 = vmax.f32 %v1652_v10, 0.0  ;;  %v1655_v23 = vadd.f32 %v3271_v26, %v1654_v37 }
 0x410   : > { %v1696_v51 = vadd.f32 %v1680_v13, %v3455_v29  ;;  %v1681_v28 = vmax.f32 %v1663_v21, 0.0 }
 0x411   : > { %v1694_v60 = vadd.f32 %v1678_v22, %v3456_v63  ;;  %v1679_v62 = vmax.f32 %v1655_v23, 0.0 }
 0x412   : > { %v1712_v0 = vmax.f32 %v1696_v51, 0.0  ;;  %v1697_v32 = vadd.f32 %v1681_v28, %v3457_v35 }
 0x413   : > { %v1710_v48 = vmax.f32 %v1694_v60, 0.0  ;;  %v1695_v38 = vadd.f32 %v1679_v62, %v3458_v20 }
 0x414   : > { %1728 = vst [vmem:[%s2547_s11 + $0x70] sm:$0xff] %v1712_v0  ;;  %v1713_v26 = vmax.f32 %v1697_v32, 0.0 }
 0x415   : > { %1726 = vst [vmem:[%s2547_s11 + $0x60] sm:$0xff] %v1710_v48  ;;  %v1711_v61 = vmax.f32 %v1695_v38, 0.0 }
 0x416   : > { %1729 = vst [vmem:[%s2547_s11 + $0x78] sm:$0xff] %v1713_v26 }
 0x417   : > { %1727 = vst [vmem:[%s2547_s11 + $0x68] sm:$0xff] %v1711_v61 }
 0x418   : > { %2304 = shalt.err (!%p2301_p5)
}
 0x419   : > { %s2305_s20 = scalar_lea.hbm %s3327_s10, 2048  ;;  %s2309_s12 = scalar_lea.hbm %s3392_s7, 8192 }
 0x41a   : > { %p2306_p6 = scmp.ne.s32.totalorder %s3327_s10, %s2305_s20  ;;  %p2310_p10 = scmp.lt.u32.totalorder %s3327_s10, %s3392_s7 }
 0x41b   : > { %p2311_p11 = scmp.lt.u32.totalorder %s2309_s12, %s2305_s20  ;;  %p2313_p13 = scmp.lt.u32.totalorder %s2305_s20, %s3327_s10 }
 0x41c   : > { %p2307_p7 = pnand %p2306_p6, %p2486_p3 }
 0x41d   : > { %p2312_p12 = por %p2311_p11, %p2310_p10 }
 0x41e   : > { %p2308_p9 = pneg %p2307_p7 }
 0x41f   : > { %p2314_p0 = por %p2313_p13, %p2312_p12 }
 0x421   : > { %p2315_p1 = pnand %p2314_p0, %p2308_p9 }
 0x423   : > { %2318 = shalt.err (!%p2315_p1)
}
 0x424   : > { %s2393_s22 = smov 128   ;;  %s2394_s16 = smov 8  }
 0x425   : > { %2087 = dma.vmem_to_hbm [thread:$0]  (%p2486_p3), %s3321_s27, 2048, %s3327_s10, %s3333_s13, %s2393_s22, %s2393_s22, %s2394_s16  }
 0x426 PF: > { %p2093_p2 = scmp.ge.s32.totalorder %s2387_s8, 2  ;;  %s1762_s17 = sand.u32 1, %s2359_s24  }
 0x427   : > { %s1763_s18 = scalar_lea.sflag [#allocation5], %s1762_s17 }
 0x428   : > { %p2090_p4 = pnand %p2093_p2, %p2495_p8 }
 0x42a   : > { %2354 = dma.done.wait (!%p2090_p4), %s1763_s18, 2048  }
 0x42b   : > { %2356 = vsyncadd (!%p2090_p4), %s1763_s18, 4294965248  ;;  %s20_s8 = sadd.s32 1, %s2387_s8   ;;  %s3459_s14 = sld [smem:[#allocation9_spill]] }
 0x42c   : > { %p17_p5 = scmp.ge.s32.totalorder %s20_s8, 6   ;;  %s3460_s10 = sld [smem:[#allocation10_spill]] }
 0x42d   : > { %s3461_s24 = smov %s2363_s25  ;;  %s3462_s25 = smov %s2367_s26 }
 0x42e   : > { %s3463_s26 = smov %s2504_s19  ;;  %s3464_s27 = smov %s2379_s29 }
 0x42f   : > { %s3465_s28 = smov %s2383_s30  ;;  %19 = sbr.rel (!%p17_p5) target bundleno = 5 (0x5), region = 119 }
 0x431   : > { %s3466_s29 = smov %s3459_s14 }
 0x432   : > { %s3467_s30 = smov %s3460_s10 }
 0x436   :  { %1768 = vsyncpa [#allocation5], 1 }
 0x437   :  { %1770 = vsyncpa [#allocation5 + $0x1], 1 }
 0x438   :  { %1771 = vsyncmov [#allocation3] }
 0x43b   :  { %s1772_s15 = vpop.sfrf %1771 }
 0x43c   :  { %p1890_p3 = scmp.ne.s32.totalorder %s1772_s15, 0 }
 0x43e   :  { %1776 = shalt.err (%p1890_p3)  }

</bundles_post_ra>
